<compile_context>
chip_gen: v6e
topology: v6e:2x2x1
jax: 0.10.0
libtpu: 0.0.40
codegen_flags: <defaults>
</compile_context>

<pallas_src>
import functools

import jax
import jax.numpy as jnp
from jax.experimental import pallas as pl
from jax.experimental.pallas import tpu as pltpu


def _mlp_kernel(x_ref, w1_ref, b1_ref, w2_ref, b2_ref, w3t_ref, b3_ref, o_ref):
    mxu_dtype = w1_ref.dtype              # bf16 when use_bf16_mxu, else f32
    x = x_ref[...].astype(mxu_dtype)      # in-kernel cast: no extra HBM pass

    # Layer 1: Linear(in_dim -> 2*in_dim) + ReLU  (bias/ReLU kept in f32).
    h1 = jnp.dot(x, w1_ref[...], preferred_element_type=jnp.float32) + b1_ref[...]
    h1 = jnp.maximum(h1, 0.0).astype(mxu_dtype)

    # Layer 2: Linear(2*in_dim -> in_dim) + ReLU.
    h2 = jnp.dot(h1, w2_ref[...], preferred_element_type=jnp.float32) + b2_ref[...]
    h2 = jnp.maximum(h2, 0.0).astype(mxu_dtype)

    # Layer 3: contract the feature axis of W3^T (out_dim, in_dim) against the
    # feature axis of h2 (tile, in_dim) -> (out_dim, tile).  The result is
    # lane-dense in the batch-tile axis, so the store is an unmasked vst even
    # though out_dim << 128.
    z = jax.lax.dot_general(
        w3t_ref[...], h2, (((1,), (1,)), ((), ())),
        preferred_element_type=jnp.float32,
    ) + b3_ref[...]
    o_ref[...] = jax.nn.sigmoid(z).astype(o_ref.dtype)


def _round_up(x, m):
    return ((x + m - 1) // m) * m


@functools.partial(jax.jit, static_argnames=("tile_n", "use_bf16_mxu"))
def mlp_layer_forward(x, params, *, tile_n=1024, use_bf16_mxu=False):
    """Fused MLP forward; returns the flattened [N*out_dim] vector (view(-1))."""
    w1, b1, w2, b2, w3, b3 = params
    n, in_dim = x.shape
    hid = w1.shape[1]
    out_dim = w3.shape[1]
    assert tile_n % 128 == 0

    # Effective tile: large to amortize per-step overhead, clamped so the grid
    # keeps >= 2 steps (v7x megacore) and stays a multiple of 128 for a
    # lane-dense output block.  No padding of x: the ragged last block is
    # handled by Pallas (partial input read, masked output store).
    tile = max(128, min(tile_n, _round_up(pl.cdiv(n, 2), 128)))
    grid = (pl.cdiv(n, tile),)

    # bf16 MXU inputs (v6e/v7x throughput): cast only the tiny resident
    # weights in the wrapper; x is cast inside the kernel.
    mxu_dtype = jnp.bfloat16 if use_bf16_mxu else x.dtype
    w1k = w1.astype(mxu_dtype)
    w2k = w2.astype(mxu_dtype)
    w3tk = w3.T.astype(mxu_dtype)                      # (out_dim, in_dim)
    b1k = b1.astype(jnp.float32)                       # (1, hid)
    b2k = b2.astype(jnp.float32)                       # (1, in_dim)
    b3k = b3.reshape(out_dim, 1).astype(jnp.float32)   # (out_dim, 1) column

    n_weight_elems = in_dim * hid + hid * in_dim + in_dim * out_dim
    w_itemsize = jnp.dtype(mxu_dtype).itemsize
    x_itemsize = jnp.dtype(x.dtype).itemsize
    cost = pl.CostEstimate(
        flops=2 * n * n_weight_elems,
        transcendentals=2 * n * out_dim,                # sigmoid ~ exp + recip
        bytes_accessed=(n * in_dim * x_itemsize         # x stream (dominant)
                        + n_weight_elems * w_itemsize   # resident weights
                        + (hid + in_dim + out_dim) * 4  # biases
                        + n * out_dim * 4),             # output stream
    )

    full = lambda i: (0, 0)   # resident weights/biases: constant block index
    out = pl.pallas_call(
        _mlp_kernel,
        out_shape=jax.ShapeDtypeStruct((out_dim, n), jnp.float32),
        grid_spec=pl.GridSpec(
            grid=grid,
            in_specs=[
                pl.BlockSpec((tile, in_dim), lambda i: (i, 0)),   # x tile
                pl.BlockSpec((in_dim, hid), full),                # W1
                pl.BlockSpec((1, hid), full),                     # b1
                pl.BlockSpec((hid, in_dim), full),                # W2
                pl.BlockSpec((1, in_dim), full),                  # b2
                pl.BlockSpec((out_dim, in_dim), full),            # W3^T
                pl.BlockSpec((out_dim, 1), full),                 # b3
            ],
            out_specs=pl.BlockSpec((out_dim, tile), lambda i: (0, i)),
        ),
        compiler_params=pltpu.CompilerParams(dimension_semantics=("parallel",)),
        cost_estimate=cost,
    )(x, w1k, b1k, w2k, b2k, w3tk, b3k)

    # torch: self.net(x).view(-1) on the (n, out_dim) result.
    return out.T.reshape(-1)


def _xavier_uniform(key, fan_in, fan_out):
    # Matches torch.nn.init.xavier_uniform_ bound; stored as [fan_in, fan_out].
    limit = (6.0 / (fan_in + fan_out)) ** 0.5
    return jax.random.uniform(
        key, (fan_in, fan_out), dtype=jnp.float32, minval=-limit, maxval=limit
    )


def init_mlp_params(key, in_dim, out_dim=1):
    hid = in_dim * 2
    k1, k2, k3, kb1, kb2, kb3 = jax.random.split(key, 6)
    w1 = _xavier_uniform(k1, in_dim, hid)
    w2 = _xavier_uniform(k2, hid, in_dim)
    w3 = _xavier_uniform(k3, in_dim, out_dim)
    # PyTorch Linear default bias: U(-1/sqrt(fan_in), 1/sqrt(fan_in))
    b1 = jax.random.uniform(kb1, (1, hid), jnp.float32,
                            -1.0 / in_dim ** 0.5, 1.0 / in_dim ** 0.5)
    b2 = jax.random.uniform(kb2, (1, in_dim), jnp.float32,
                            -1.0 / hid ** 0.5, 1.0 / hid ** 0.5)
    b3 = jax.random.uniform(kb3, (1, out_dim), jnp.float32,
                            -1.0 / in_dim ** 0.5, 1.0 / in_dim ** 0.5)
    return (w1, b1, w2, b2, w3, b3)


def _reference_forward(x, params):
    w1, b1, w2, b2, w3, b3 = params
    h1 = jnp.maximum(x @ w1 + b1, 0.0)
    h2 = jnp.maximum(h1 @ w2 + b2, 0.0)
    return jax.nn.sigmoid(h2 @ w3 + b3).reshape(-1)


if __name__ == "__main__":
    key = jax.random.PRNGKey(0)
    in_dim = 32

    kx, kx2, kp = jax.random.split(key, 3)
    params = init_mlp_params(kp, in_dim, out_dim=1)

    # 1) batch=384 -> tile clamps to 256, grid=(2,), ragged last block, f32.
    x = jax.random.normal(kx, (384, in_dim), dtype=jnp.float32)
    y = jax.block_until_ready(mlp_layer_forward(x, params))
    y_ref = _reference_forward(x, params)
    assert y.shape == (384,)
    assert jnp.allclose(y, y_ref, atol=1e-4, rtol=1e-4)

    # 2) Small ragged batch -> tile=128, grid=(2,), 72-row partial last block.
    x2 = jax.random.normal(kx2, (200, in_dim), dtype=jnp.float32)
    y2 = jax.block_until_ready(mlp_layer_forward(x2, params))
    y2_ref = _reference_forward(x2, params)
    assert y2.shape == (200,)
    assert jnp.allclose(y2, y2_ref, atol=1e-4, rtol=1e-4)

    # 3) bf16 MXU weights + in-kernel bf16 cast of x, f32 accumulation.
    y3 = jax.block_until_ready(mlp_layer_forward(x, params, use_bf16_mxu=True))
    assert y3.shape == (384,)
    assert jnp.allclose(y3, y_ref, atol=3e-2, rtol=0.0)

    # 4) out_dim > 1: lane-dense (out_dim, N) output, transposed in wrapper.
    params4 = init_mlp_params(kp, in_dim, out_dim=4)
    y4 = jax.block_until_ready(mlp_layer_forward(x2, params4))
    y4_ref = _reference_forward(x2, params4)
    assert y4.shape == (200 * 4,)
    assert jnp.allclose(y4, y4_ref, atol=1e-4, rtol=1e-4)

    print("KERNEL_OK")
</pallas_src>

<mosaic_0001>
module attributes {stable_mosaic.version = 11 : i64} {
  func.func @_mlp_kernel(%arg0: i32, %arg1: memref<256x32xf32, #tpu.memory_space<vmem>>, %arg2: memref<32x64xf32, #tpu.memory_space<vmem>>, %arg3: memref<1x64xf32, #tpu.memory_space<vmem>>, %arg4: memref<64x32xf32, #tpu.memory_space<vmem>>, %arg5: memref<1x32xf32, #tpu.memory_space<vmem>>, %arg6: memref<1x32xf32, #tpu.memory_space<vmem>>, %arg7: memref<1x1xf32, #tpu.memory_space<vmem>>, %arg8: memref<1x256xf32, #tpu.memory_space<vmem>>) attributes {dimension_semantics = [#tpu.dimension_semantics<parallel>], iteration_bounds = array<i64: 2>, scalar_prefetch = 0 : i64, scratch_operands = 0 : i64, tpu.core_type = #tpu.core_type<tc>, window_params = [{transform_indices = @transform_0, window_bounds = array<i64: 256, 32>}, {pipeline_mode = #tpu.pipeline_mode<synchronous>, transform_indices = @transform_1, window_bounds = array<i64: 32, 64>}, {pipeline_mode = #tpu.pipeline_mode<synchronous>, transform_indices = @transform_2, window_bounds = array<i64: 1, 64>}, {pipeline_mode = #tpu.pipeline_mode<synchronous>, transform_indices = @transform_3, window_bounds = array<i64: 64, 32>}, {pipeline_mode = #tpu.pipeline_mode<synchronous>, transform_indices = @transform_4, window_bounds = array<i64: 1, 32>}, {pipeline_mode = #tpu.pipeline_mode<synchronous>, transform_indices = @transform_5, window_bounds = array<i64: 1, 32>}, {pipeline_mode = #tpu.pipeline_mode<synchronous>, transform_indices = @transform_6, window_bounds = array<i64: 1, 1>}, {transform_indices = @transform_7, window_bounds = array<i64: 1, 256>}]} {
    %c0 = arith.constant 0 : index
    %c0_0 = arith.constant 0 : index
    %0 = vector.load %arg1[%c0, %c0_0] : memref<256x32xf32, #tpu.memory_space<vmem>>, vector<256x32xf32>
    %c0_1 = arith.constant 0 : index
    %c0_2 = arith.constant 0 : index
    %1 = vector.load %arg2[%c0_1, %c0_2] : memref<32x64xf32, #tpu.memory_space<vmem>>, vector<32x64xf32>
    %cst = arith.constant dense<0.000000e+00> : vector<256x64xf32>
    %2 = tpu.matmul %0, %1, %cst {dimension_numbers = #tpu.dot_dimension_numbers<[1], [0], [0], [1], [0, 0, 1, 1], [], []>} : vector<256x32xf32>, vector<32x64xf32>, vector<256x64xf32> -> vector<256x64xf32>
    %c0_3 = arith.constant 0 : index
    %c0_4 = arith.constant 0 : index
    %3 = vector.load %arg3[%c0_3, %c0_4] : memref<1x64xf32, #tpu.memory_space<vmem>>, vector<1x64xf32>
    %4 = vector.broadcast %3 : vector<1x64xf32> to vector<256x64xf32>
    %5 = arith.addf %2, %4 : vector<256x64xf32>
    %cst_5 = arith.constant 0.000000e+00 : f32
    %6 = vector.broadcast %cst_5 : f32 to vector<256x64xf32>
    %7 = arith.maximumf %5, %6 : vector<256x64xf32>
    %c0_6 = arith.constant 0 : index
    %c0_7 = arith.constant 0 : index
    %8 = vector.load %arg4[%c0_6, %c0_7] : memref<64x32xf32, #tpu.memory_space<vmem>>, vector<64x32xf32>
    %cst_8 = arith.constant dense<0.000000e+00> : vector<256x32xf32>
    %9 = tpu.matmul %7, %8, %cst_8 {dimension_numbers = #tpu.dot_dimension_numbers<[1], [0], [0], [1], [0, 0, 1, 1], [], []>} : vector<256x64xf32>, vector<64x32xf32>, vector<256x32xf32> -> vector<256x32xf32>
    %c0_9 = arith.constant 0 : index
    %c0_10 = arith.constant 0 : index
    %10 = vector.load %arg5[%c0_9, %c0_10] : memref<1x32xf32, #tpu.memory_space<vmem>>, vector<1x32xf32>
    %11 = vector.broadcast %10 : vector<1x32xf32> to vector<256x32xf32>
    %12 = arith.addf %9, %11 : vector<256x32xf32>
    %cst_11 = arith.constant 0.000000e+00 : f32
    %13 = vector.broadcast %cst_11 : f32 to vector<256x32xf32>
    %14 = arith.maximumf %12, %13 : vector<256x32xf32>
    %c0_12 = arith.constant 0 : index
    %c0_13 = arith.constant 0 : index
    %15 = vector.load %arg6[%c0_12, %c0_13] : memref<1x32xf32, #tpu.memory_space<vmem>>, vector<1x32xf32>
    %cst_14 = arith.constant dense<0.000000e+00> : vector<1x256xf32>
    %16 = tpu.matmul %15, %14, %cst_14 {dimension_numbers = #tpu.dot_dimension_numbers<[1], [1], [0], [0], [0, 0, 1, 0], [], []>} : vector<1x32xf32>, vector<256x32xf32>, vector<1x256xf32> -> vector<1x256xf32>
    %c0_15 = arith.constant 0 : index
    %c0_16 = arith.constant 0 : index
    %17 = vector.load %arg7[%c0_15, %c0_16] : memref<1x1xf32, #tpu.memory_space<vmem>>, vector<1x1xf32>
    %18 = vector.broadcast %17 : vector<1x1xf32> to vector<1x256xf32>
    %19 = arith.addf %16, %18 : vector<1x256xf32>
    %20 = arith.negf %19 : vector<1x256xf32>
    %21 = math.exp %20 : vector<1x256xf32>
    %cst_17 = arith.constant 1.000000e+00 : f32
    %22 = vector.broadcast %cst_17 : f32 to vector<1x256xf32>
    %23 = arith.addf %22, %21 : vector<1x256xf32>
    %24 = arith.divf %22, %23 : vector<1x256xf32>
    %c0_18 = arith.constant 0 : index
    %c0_19 = arith.constant 0 : index
    %25 = vector.load %arg8[%c0_18, %c0_19] : memref<1x256xf32, #tpu.memory_space<vmem>>, vector<1x256xf32>
    tpu.vector_store %arg8[%c0_18, %c0_19], %24 {strides = array<i32>} : memref<1x256xf32, #tpu.memory_space<vmem>>, vector<1x256xf32>,
    return
  }
  func.func @transform_0(%arg0: i32) -> (i32, i32) {
    %c0_i32 = arith.constant 0 : i32
    %c0_i32_0 = arith.constant 0 : i32
    return %arg0, %c0_i32 : i32, i32
  }
  func.func @transform_1(%arg0: i32) -> (i32, i32) {
    %c0_i32 = arith.constant 0 : i32
    %c0_i32_0 = arith.constant 0 : i32
    %c0_i32_1 = arith.constant 0 : i32
    return %c0_i32, %c0_i32_0 : i32, i32
  }
  func.func @transform_2(%arg0: i32) -> (i32, i32) {
    %c0_i32 = arith.constant 0 : i32
    %c0_i32_0 = arith.constant 0 : i32
    %c0_i32_1 = arith.constant 0 : i32
    return %c0_i32, %c0_i32_0 : i32, i32
  }
  func.func @transform_3(%arg0: i32) -> (i32, i32) {
    %c0_i32 = arith.constant 0 : i32
    %c0_i32_0 = arith.constant 0 : i32
    %c0_i32_1 = arith.constant 0 : i32
    return %c0_i32, %c0_i32_0 : i32, i32
  }
  func.func @transform_4(%arg0: i32) -> (i32, i32) {
    %c0_i32 = arith.constant 0 : i32
    %c0_i32_0 = arith.constant 0 : i32
    %c0_i32_1 = arith.constant 0 : i32
    return %c0_i32, %c0_i32_0 : i32, i32
  }
  func.func @transform_5(%arg0: i32) -> (i32, i32) {
    %c0_i32 = arith.constant 0 : i32
    %c0_i32_0 = arith.constant 0 : i32
    %c0_i32_1 = arith.constant 0 : i32
    return %c0_i32, %c0_i32_0 : i32, i32
  }
  func.func @transform_6(%arg0: i32) -> (i32, i32) {
    %c0_i32 = arith.constant 0 : i32
    %c0_i32_0 = arith.constant 0 : i32
    %c0_i32_1 = arith.constant 0 : i32
    return %c0_i32, %c0_i32_0 : i32, i32
  }
  func.func @transform_7(%arg0: i32) -> (i32, i32) {
    %c0_i32 = arith.constant 0 : i32
    %c0_i32_0 = arith.constant 0 : i32
    return %c0_i32, %arg0 : i32, i32
  }
}

</mosaic_0001>

<bundles_post_ra>
// kernel: mlp_layer_forward.1
= control target key start
LH: loop header
LB: loop body
LE: loop exit
PB: predicated region body
PF: predicated region fallthrough
CT: control target
= control target key end

     0   :  { %s3321_s0 = inlined_call_operand.vmem [shape: f32[384,32], index: 0, kind: input, shape index: {}]   ;;  %s3322_s1 = inlined_call_operand.vmem [shape: f32[32,64], index: 1, kind: input, shape index: {}]   ;;  %s3323_s2 = inlined_call_operand.vmem [shape: f32[1,64], index: 2, kind: input, shape index: {}]   ;;  %s3324_s3 = inlined_call_operand.vmem [shape: f32[64,32], index: 3, kind: input, shape index: {}]   ;;  %s3325_s4 = inlined_call_operand.vmem [shape: f32[1,32], index: 4, kind: input, shape index: {}]   ;;  %s3326_s5 = inlined_call_operand.vmem [shape: f32[1,32], index: 5, kind: input, shape index: {}]   ;;  %s3327_s6 = inlined_call_operand.<no memory space> [shape: f32[1,1], index: 6, kind: input, shape index: {}]   ;;  %s3328_s7 = inlined_call_operand.vmem [shape: f32[1,384], index: 7, kind: output, shape index: {}]  }
   0x1   :  { %v12_v0 = vstv %s3327_s6 }
   0x2   :  { %13 = vst [vmem:[#allocation2] sm:$0x1] %v12_v0 }
   0x3   :  { %s2568_s26 = smov 0   ;;  %s2570_s27 = smov 0  }
   0x4   :  { %s2572_s28 = smov 0  }
   0x5 LB: > { %s2581_s6 = sadd.s32 4294967295, %s2455_s28   ;;  %s2583_s29 = sadd.s32 1, %s2455_s28   ;;  %s2455_s28 = sphi %s2572_s28, %s3342_s28   ;;  %s2451_s27 = sphi %s2570_s27, %s3341_s27   ;;  %s2447_s26 = sphi %s2568_s26, %s3340_s26  }
   0x6   : > { %s175_s30 = ssub.s32 %s2455_s28, %s2583_s29  ;;  %s178_s8 = sadd.s32 1, %s2451_s27 }
   0x7   : > { %p176_p0 = scmp.eq.s32.totalorder %s175_s30, 0  ;;  %p188_p1 = scmp.ne.s32.totalorder %s2451_s27, %s2447_s26 }
   0x8   : > { %p189_p2 = scmp.eq.s32.totalorder %s2581_s6, 1  ;;  %p1836_p3 = scmp.ge.s32.totalorder %s2455_s28, 1 }
   0x9   : > { %s2591_s9 = scalar_select %p176_p0, %s2451_s27, %s178_s8  }
   0xa   : > { %p2593_p4 = por %p189_p2, %p188_p1  ;;  %p248_p5 = scmp.lt.s32.totalorder %s2455_s28, 3 }
   0xc   : > { %p249_p6 = pnand %p1836_p3, %p248_p5 }
   0xd   : > { %s1838_s15 = sshll.u32 (!%p249_p6), %s2581_s6, 5  ;;  %s280_s8 = sand.u32 (!%p249_p6), 1, %s2447_s26  }
   0xe   : > { %252 = sbr.rel (%p249_p6) target bundleno = 931 (0x3a3), region = 48  ;;  %p288_p7 = scmp.lt.s32.totalorder (!%p249_p6), %s1838_s15, 47 }
  0x13   : > { %v337_v1 = vld [vmem:[%s3322_s1 + $0x18] sm:$0xff]  ;;  %v336_v2 = vld [vmem:[%s3322_s1 + $0x10] sm:$0xff]  ;;  %v335_v5 = vld [vmem:[%s3322_s1 + $0x8] sm:$0xff]  ;;  %s3344_s15 = smov (!%p288_p7, %s1838_s15), 47  ;;  %vm345_vm0 = vcmask 261120   ;;  %vm714_vm1 = vcmask 523264  }
  0x14   : > { %2084 = vmatprep.subr.mxu0 %v337_v1  ;;  %v706_v3 = vld [vmem:[%s3324_s3 + $0x38] sm:$0xff]  ;;  %v705_v4 = vld [vmem:[%s3324_s3 + $0x30] sm:$0xff]  ;;  %v704_v6 = vld [vmem:[%s3324_s3 + $0x28] sm:$0xff]  ;;  %s1839_s28 = sshll.u32 %s3344_s15, 3  ;;  %s1942_s13 = sshll.u32 (%p2593_p4), %s2581_s6, 1 }
  0x15   : > { %2085 = vmatpush3.msra.mxu0 %v337_v1  ;;  %2140 = vmatprep.subr.mxu1 %v706_v3  ;;  %v334_v7 = vld [vmem:[%s3322_s1] sm:$0xff]  ;;  %s2622_s11 = scalar_lea.vmem %s3321_s0, %s1839_s28  ;;  %v702_v41 = vld [vmem:[%s3324_s3 + $0x18] sm:$0xff]  ;;  %v701_v42 = vld [vmem:[%s3324_s3 + $0x10] sm:$0xff]  ;;  %s1292_s14 = ssub.s32 (%p2593_p4), 3, %s1942_s13 }
  0x16   : > { %2086 = vmatprep.subr.mxu0 %v336_v2  ;;  %2141 = vmatpush3.msra.mxu1 %v706_v3  ;;  %v703_v8 = vld [vmem:[%s3324_s3 + $0x20] sm:$0xff]  ;;  %v303_v10 = vld [vmem:[%s2622_s11 + $0x8] sm:$0xff]  ;;  %v304_v11 = vld [vmem:[%s2622_s11 + $0x10] sm:$0xff]  ;;  %s2905_s16 = scalar_lea.vmem (%p2593_p4), %s3328_s7, %s1942_s13   ;;  %p1293_p8 = scmp.lt.s32.totalorder (%p2593_p4), %s1292_s14, 2 }
  0x17   : > { %2087 = vmatpush3.msra.mxu0 %v336_v2  ;;  %2142 = vmatprep.subr.mxu1 %v705_v4  ;;  %v302_v9 = vld [vmem:[%s2622_s11] sm:$0xff]  ;;  %v305_v12 = vld [vmem:[%s2622_s11 + $0x18] sm:$0xff]  ;;  %v307_v14 = vld [vmem:[%s2622_s11 + $0x28] sm:$0xff] }
  0x18   : > { %2088 = vmatprep.subr.mxu0 %v335_v5  ;;  %2143 = vmatpush3.msra.mxu1 %v705_v4  ;;  %v306_v13 = vld [vmem:[%s2622_s11 + $0x20] sm:$0xff]  ;;  %v308_v15 = vld [vmem:[%s2622_s11 + $0x30] sm:$0xff]  ;;  %v309_v16 = vld [vmem:[%s2622_s11 + $0x38] sm:$0xff] }
  0x19   : > { %2089 = vmatpush3.msra.mxu0 %v335_v5  ;;  %2144 = vmatprep.subr.mxu1 %v704_v6  ;;  %v310_v17 = vld [vmem:[%s2622_s11 + $0x40] sm:$0xff]  ;;  %v311_v18 = vld [vmem:[%s2622_s11 + $0x48] sm:$0xff]  ;;  %v312_v19 = vld [vmem:[%s2622_s11 + $0x50] sm:$0xff] }
  0x1a   : > { %2090 = vmatprep.subr.mxu0 %v334_v7  ;;  %2145 = vmatpush3.msra.mxu1 %v704_v6  ;;  %v313_v20 = vld [vmem:[%s2622_s11 + $0x58] sm:$0xff]  ;;  %v314_v21 = vld [vmem:[%s2622_s11 + $0x60] sm:$0xff]  ;;  %v315_v22 = vld [vmem:[%s2622_s11 + $0x68] sm:$0xff] }
  0x1b   : > { %2091 = vmatpush3.msra.mxu0 %v334_v7  ;;  %2092 = vmatprep.mubr.msk.f32.mxu0 %vm345_vm0, %v302_v9  ;;  %v316_v23 = vld [vmem:[%s2622_s11 + $0x70] sm:$0xff]  ;;  %v317_v24 = vld [vmem:[%s2622_s11 + $0x78] sm:$0xff]  ;;  %v318_v25 = vld [vmem:[%s2622_s11 + $0x80] sm:$0xff] }
  0x1c   : > { %2093 = vmatmul.mubr.msk.f32.vlgmr.msra.gmra.mxu0 %vm345_vm0, %v303_v10  ;;  %2146 = vmatprep.subr.mxu1 %v703_v8  ;;  %v319_v26 = vld [vmem:[%s2622_s11 + $0x88] sm:$0xff]  ;;  %v320_v27 = vld [vmem:[%s2622_s11 + $0x90] sm:$0xff]  ;;  %v321_v28 = vld [vmem:[%s2622_s11 + $0x98] sm:$0xff] }
  0x1d   : > { %2095 = vmatprep.mubr.msk.f32.mxu0 %vm345_vm0, %v304_v11  ;;  %2147 = vmatpush3.msra.mxu1 %v703_v8  ;;  %v322_v29 = vld [vmem:[%s2622_s11 + $0xa0] sm:$0xff]  ;;  %v323_v30 = vld [vmem:[%s2622_s11 + $0xa8] sm:$0xff]  ;;  %v324_v31 = vld [vmem:[%s2622_s11 + $0xb0] sm:$0xff] }
  0x1e   : > { %v325_v32 = vld [vmem:[%s2622_s11 + $0xb8] sm:$0xff]  ;;  %v326_v33 = vld [vmem:[%s2622_s11 + $0xc0] sm:$0xff]  ;;  %v327_v34 = vld [vmem:[%s2622_s11 + $0xc8] sm:$0xff]  ;;  %2148 = vmatprep.subr.mxu1 %v702_v41 }
  0x1f   : > { %v328_v35 = vld [vmem:[%s2622_s11 + $0xd0] sm:$0xff]  ;;  %v329_v36 = vld [vmem:[%s2622_s11 + $0xd8] sm:$0xff]  ;;  %v330_v37 = vld [vmem:[%s2622_s11 + $0xe0] sm:$0xff]  ;;  %2149 = vmatpush3.msra.mxu1 %v702_v41 }
  0x20   : > { %2096 = vmatmul.mubr.msk.f32.gmra.mxu0 %vm345_vm0, %v305_v12  ;;  %v331_v38 = vld [vmem:[%s2622_s11 + $0xe8] sm:$0xff]  ;;  %v332_v39 = vld [vmem:[%s2622_s11 + $0xf0] sm:$0xff]  ;;  %v333_v40 = vld [vmem:[%s2622_s11 + $0xf8] sm:$0xff]  ;;  %2150 = vmatprep.subr.mxu1 %v701_v42  ;;  %s1837_s11 = sshll.u32 %s280_s8, 1 }
  0x21   : > { %2098 = vmatprep.mubr.msk.f32.mxu0 %vm345_vm0, %v306_v13  ;;  %2151 = vmatpush3.msra.mxu1 %v701_v42  ;;  %v700_v43 = vld [vmem:[%s3324_s3 + $0x8] sm:$0xff]  ;;  %v699_v44 = vld [vmem:[%s3324_s3] sm:$0xff]  ;;  %s2896_s12 = scalar_lea.vmem [#allocation3], %s1837_s11  }
  0x22   : > { %2152 = vmatprep.subr.mxu1 %v700_v43  ;;  %v2706_v45 = vld [vmem:[%s3323_s2] ss:$0 sm:$0xff] }
  0x23   : > { %2153 = vmatpush3.msra.mxu1 %v700_v43 }
  0x24   : > { %2099 = vmatmul.mubr.msk.f32.gmra.mxu0 %vm345_vm0, %v307_v14  ;;  %2154 = vmatprep.subr.mxu1 %v699_v44 }
  0x25   : > { %2101 = vmatprep.mubr.msk.f32.mxu0 %vm345_vm0, %v308_v15  ;;  %2155 = vmatpush3.msra.mxu1 %v699_v44 }
  0x28   : > { %2102 = vmatmul.mubr.msk.f32.gmra.mxu0 %vm345_vm0, %v309_v16 }
  0x29   : > { %2104 = vmatprep.mubr.msk.f32.mxu0 %vm345_vm0, %v310_v17 }
  0x2c   : > { %2105 = vmatmul.mubr.msk.f32.gmra.mxu0 %vm345_vm0, %v311_v18 }
  0x2d   : > { %2107 = vmatprep.mubr.msk.f32.mxu0 %vm345_vm0, %v312_v19 }
  0x30   : > { %2108 = vmatmul.mubr.msk.f32.gmra.mxu0 %vm345_vm0, %v313_v20 }
  0x31   : > { %2110 = vmatprep.mubr.msk.f32.mxu0 %vm345_vm0, %v314_v21 }
  0x34   : > { %2111 = vmatmul.mubr.msk.f32.gmra.mxu0 %vm345_vm0, %v315_v22 }
  0x35   : > { %2113 = vmatprep.mubr.msk.f32.mxu0 %vm345_vm0, %v316_v23 }
  0x38   : > { %2114 = vmatmul.mubr.msk.f32.gmra.mxu0 %vm345_vm0, %v317_v24 }
  0x39   : > { %2116 = vmatprep.mubr.msk.f32.mxu0 %vm345_vm0, %v318_v25 }
  0x3c   : > { %2117 = vmatmul.mubr.msk.f32.gmra.mxu0 %vm345_vm0, %v319_v26 }
  0x3d   : > { %2119 = vmatprep.mubr.msk.f32.mxu0 %vm345_vm0, %v320_v27 }
  0x40   : > { %2120 = vmatmul.mubr.msk.f32.gmra.mxu0 %vm345_vm0, %v321_v28 }
  0x41   : > { %2122 = vmatprep.mubr.msk.f32.mxu0 %vm345_vm0, %v322_v29 }
  0x44   : > { %2123 = vmatmul.mubr.msk.f32.gmra.mxu0 %vm345_vm0, %v323_v30 }
  0x45   : > { %2125 = vmatprep.mubr.msk.f32.mxu0 %vm345_vm0, %v324_v31 }
  0x48   : > { %2126 = vmatmul.mubr.msk.f32.gmra.mxu0 %vm345_vm0, %v325_v32 }
  0x49   : > { %2128 = vmatprep.mubr.msk.f32.mxu0 %vm345_vm0, %v326_v33 }
  0x4c   : > { %2129 = vmatmul.mubr.msk.f32.gmra.mxu0 %vm345_vm0, %v327_v34 }
  0x4d   : > { %2131 = vmatprep.mubr.msk.f32.mxu0 %vm345_vm0, %v328_v35 }
  0x50   : > { %2132 = vmatmul.mubr.msk.f32.gmra.mxu0 %vm345_vm0, %v329_v36 }
  0x51   : > { %2134 = vmatprep.mubr.msk.f32.mxu0 %vm345_vm0, %v330_v37 }
  0x54   : > { %2135 = vmatmul.mubr.msk.f32.gmra.mxu0 %vm345_vm0, %v331_v38 }
  0x55   : > { %2137 = vmatprep.mubr.msk.f32.mxu0 %vm345_vm0, %v332_v39 }
  0x58   : > { %2138 = vmatmul.mubr.msk.f32.gmra.mxu0 %vm345_vm0, %v333_v40 }
  0xdc   : > { %v2094_v46 = vpop.f32.mrf.mxu0 }
  0xdd   : > { %v514_v47 = vadd.f32 %v2094_v46, %v2706_v45 }
  0xde   : > { %v508_v48 = vpop.f32.mrf.mxu0 }
  0xdf   : > { %v509_v49 = vadd.f32 %v2706_v45, %v508_v48  ;;  %v668_v52 = vmax.f32 %v514_v47, 0.0 }
  0xe0   : > { %v2097_v50 = vpop.f32.mrf.mxu0 }
  0xe1   : > { %v667_v51 = vmax.f32 %v509_v49, 0.0  ;;  %v524_v53 = vadd.f32 %v2097_v50, %v2706_v45 }
  0xe2   : > { %v518_v54 = vpop.f32.mrf.mxu0 }
  0xe3   : > { %v519_v55 = vadd.f32 %v2706_v45, %v518_v54  ;;  %2156 = vmatprep.mubr.msk.f32.mxu1 %vm714_vm1, %v667_v51  ;;  %v670_v58 = vmax.f32 %v524_v53, 0.0 }
  0xe4   : > { %v2100_v56 = vpop.f32.mrf.mxu0  ;;  %2157 = vmatmul.mubr.msk.f32.vlgmr.msra.gmra.mxu1 %vm714_vm1, %v668_v52 }
  0xe5   : > { %v669_v57 = vmax.f32 %v519_v55, 0.0  ;;  %v534_v59 = vadd.f32 %v2100_v56, %v2706_v45 }
  0xe6   : > { %v528_v60 = vpop.f32.mrf.mxu0 }
  0xe7   : > { %v529_v61 = vadd.f32 %v2706_v45, %v528_v60  ;;  %2159 = vmatprep.mubr.msk.f32.mxu1 %vm714_vm1, %v669_v57  ;;  %v672_v0 = vmax.f32 %v534_v59, 0.0 }
  0xe8   : > { %v2103_v62 = vpop.f32.mrf.mxu0  ;;  %2160 = vmatmul.mubr.msk.f32.gmra.mxu1 %vm714_vm1, %v670_v58 }
  0xe9   : > { %v671_v63 = vmax.f32 %v529_v61, 0.0  ;;  %v544_v1 = vadd.f32 %v2103_v62, %v2706_v45 }
  0xea   : > { %v538_v2 = vpop.f32.mrf.mxu0 }
  0xeb   : > { %v539_v3 = vadd.f32 %v2706_v45, %v538_v2  ;;  %2162 = vmatprep.mubr.msk.f32.mxu1 %vm714_vm1, %v671_v63  ;;  %v674_v6 = vmax.f32 %v544_v1, 0.0 }
  0xec   : > { %v2106_v4 = vpop.f32.mrf.mxu0  ;;  %2163 = vmatmul.mubr.msk.f32.gmra.mxu1 %vm714_vm1, %v672_v0 }
  0xed   : > { %v673_v5 = vmax.f32 %v539_v3, 0.0  ;;  %v554_v7 = vadd.f32 %v2106_v4, %v2706_v45 }
  0xee   : > { %v548_v8 = vpop.f32.mrf.mxu0 }
  0xef   : > { %v549_v9 = vadd.f32 %v2706_v45, %v548_v8  ;;  %2165 = vmatprep.mubr.msk.f32.mxu1 %vm714_vm1, %v673_v5  ;;  %v676_v12 = vmax.f32 %v554_v7, 0.0 }
  0xf0   : > { %v2109_v10 = vpop.f32.mrf.mxu0  ;;  %2166 = vmatmul.mubr.msk.f32.gmra.mxu1 %vm714_vm1, %v674_v6 }
  0xf1   : > { %v675_v11 = vmax.f32 %v549_v9, 0.0  ;;  %v564_v13 = vadd.f32 %v2109_v10, %v2706_v45 }
  0xf2   : > { %v558_v14 = vpop.f32.mrf.mxu0 }
  0xf3   : > { %v559_v15 = vadd.f32 %v2706_v45, %v558_v14  ;;  %2168 = vmatprep.mubr.msk.f32.mxu1 %vm714_vm1, %v675_v11  ;;  %v678_v18 = vmax.f32 %v564_v13, 0.0 }
  0xf4   : > { %v2112_v16 = vpop.f32.mrf.mxu0  ;;  %2169 = vmatmul.mubr.msk.f32.gmra.mxu1 %vm714_vm1, %v676_v12 }
  0xf5   : > { %v677_v17 = vmax.f32 %v559_v15, 0.0  ;;  %v574_v19 = vadd.f32 %v2112_v16, %v2706_v45  ;;  %v2775_v15 = vld [vmem:[%s3326_s5] sm:$0x1] }
  0xf6   : > { %v568_v20 = vpop.f32.mrf.mxu0  ;;  %2082 = vmatprep.mubr.msk.f32.mxu0 %vm345_vm0, %v2775_v15 }
  0xf7   : > { %v569_v21 = vadd.f32 %v2706_v45, %v568_v20  ;;  %2171 = vmatprep.mubr.msk.f32.mxu1 %vm714_vm1, %v677_v17  ;;  %v680_v24 = vmax.f32 %v574_v19, 0.0 }
  0xf8   : > { %v2115_v22 = vpop.f32.mrf.mxu0  ;;  %2172 = vmatmul.mubr.msk.f32.gmra.mxu1 %vm714_vm1, %v678_v18  ;;  %v2521_v18 = vmov 0  }
  0xf9   : > { %v679_v23 = vmax.f32 %v569_v21, 0.0  ;;  %v584_v25 = vadd.f32 %v2115_v22, %v2706_v45  ;;  %2360 = vset.pattern.permute.xlu0 %v2521_v18 }
  0xfa   : > { %v578_v26 = vpop.f32.mrf.mxu0 }
  0xfb   : > { %v579_v27 = vadd.f32 %v2706_v45, %v578_v26  ;;  %2174 = vmatprep.mubr.msk.f32.mxu1 %vm714_vm1, %v679_v23  ;;  %v682_v30 = vmax.f32 %v584_v25, 0.0 }
  0xfc   : > { %v2118_v28 = vpop.f32.mrf.mxu0  ;;  %2175 = vmatmul.mubr.msk.f32.gmra.mxu1 %vm714_vm1, %v680_v24 }
  0xfd   : > { %v681_v29 = vmax.f32 %v579_v27, 0.0  ;;  %v594_v31 = vadd.f32 %v2118_v28, %v2706_v45 }
  0xfe   : > { %v588_v32 = vpop.f32.mrf.mxu0 }
  0xff   : > { %v589_v33 = vadd.f32 %v2706_v45, %v588_v32  ;;  %2177 = vmatprep.mubr.msk.f32.mxu1 %vm714_vm1, %v681_v29  ;;  %v684_v36 = vmax.f32 %v594_v31, 0.0 }
 0x100   : > { %v2121_v34 = vpop.f32.mrf.mxu0  ;;  %2178 = vmatmul.mubr.msk.f32.gmra.mxu1 %vm714_vm1, %v682_v30 }
 0x101   : > { %v683_v35 = vmax.f32 %v589_v33, 0.0  ;;  %v604_v37 = vadd.f32 %v2121_v34, %v2706_v45 }
 0x102   : > { %v598_v38 = vpop.f32.mrf.mxu0 }
 0x103   : > { %v599_v39 = vadd.f32 %v2706_v45, %v598_v38  ;;  %2180 = vmatprep.mubr.msk.f32.mxu1 %vm714_vm1, %v683_v35  ;;  %v686_v42 = vmax.f32 %v604_v37, 0.0 }
 0x104   : > { %v2124_v40 = vpop.f32.mrf.mxu0  ;;  %2181 = vmatmul.mubr.msk.f32.gmra.mxu1 %vm714_vm1, %v684_v36 }
 0x105   : > { %v685_v41 = vmax.f32 %v599_v39, 0.0  ;;  %v614_v43 = vadd.f32 %v2124_v40, %v2706_v45 }
 0x106   : > { %v608_v44 = vpop.f32.mrf.mxu0 }
 0x107   : > { %v609_v46 = vadd.f32 %v2706_v45, %v608_v44  ;;  %2183 = vmatprep.mubr.msk.f32.mxu1 %vm714_vm1, %v685_v41  ;;  %v688_v49 = vmax.f32 %v614_v43, 0.0 }
 0x108   : > { %v2127_v47 = vpop.f32.mrf.mxu0  ;;  %2184 = vmatmul.mubr.msk.f32.gmra.mxu1 %vm714_vm1, %v686_v42 }
 0x109   : > { %v687_v48 = vmax.f32 %v609_v46, 0.0  ;;  %v624_v50 = vadd.f32 %v2127_v47, %v2706_v45 }
 0x10a   : > { %v618_v51 = vpop.f32.mrf.mxu0 }
 0x10b   : > { %v619_v52 = vadd.f32 %v2706_v45, %v618_v51  ;;  %2186 = vmatprep.mubr.msk.f32.mxu1 %vm714_vm1, %v687_v48  ;;  %v690_v55 = vmax.f32 %v624_v50, 0.0  ;;  %v2812_v48 = vld [vmem:[%s3325_s4] ss:$0 sm:$0xff] }
 0x10c   : > { %v2130_v53 = vpop.f32.mrf.mxu0  ;;  %2187 = vmatmul.mubr.msk.f32.gmra.mxu1 %vm714_vm1, %v688_v49 }
 0x10d   : > { %v689_v54 = vmax.f32 %v619_v52, 0.0  ;;  %v634_v56 = vadd.f32 %v2130_v53, %v2706_v45 }
 0x10e   : > { %v628_v57 = vpop.f32.mrf.mxu0 }
 0x10f   : > { %v629_v58 = vadd.f32 %v2706_v45, %v628_v57  ;;  %2189 = vmatprep.mubr.msk.f32.mxu1 %vm714_vm1, %v689_v54  ;;  %v692_v61 = vmax.f32 %v634_v56, 0.0 }
 0x110   : > { %v2133_v59 = vpop.f32.mrf.mxu0  ;;  %2190 = vmatmul.mubr.msk.f32.gmra.mxu1 %vm714_vm1, %v690_v55 }
 0x111   : > { %v691_v60 = vmax.f32 %v629_v58, 0.0  ;;  %v644_v62 = vadd.f32 %v2133_v59, %v2706_v45 }
 0x112   : > { %v638_v63 = vpop.f32.mrf.mxu0 }
 0x113   : > { %v639_v0 = vadd.f32 %v2706_v45, %v638_v63  ;;  %2192 = vmatprep.mubr.msk.f32.mxu1 %vm714_vm1, %v691_v60  ;;  %v694_v3 = vmax.f32 %v644_v62, 0.0 }
 0x114   : > { %v2136_v1 = vpop.f32.mrf.mxu0  ;;  %2193 = vmatmul.mubr.msk.f32.gmra.mxu1 %vm714_vm1, %v692_v61 }
 0x115   : > { %v693_v2 = vmax.f32 %v639_v0, 0.0  ;;  %v654_v4 = vadd.f32 %v2136_v1, %v2706_v45 }
 0x116   : > { %v648_v5 = vpop.f32.mrf.mxu0 }
 0x117   : > { %v649_v6 = vadd.f32 %v2706_v45, %v648_v5  ;;  %2195 = vmatprep.mubr.msk.f32.mxu1 %vm714_vm1, %v693_v2  ;;  %v696_v9 = vmax.f32 %v654_v4, 0.0 }
 0x118   : > { %v2139_v7 = vpop.f32.mrf.mxu0  ;;  %2196 = vmatmul.mubr.msk.f32.gmra.mxu1 %vm714_vm1, %v694_v3 }
 0x119   : > { %v695_v8 = vmax.f32 %v649_v6, 0.0  ;;  %v664_v10 = vadd.f32 %v2139_v7, %v2706_v45 }
 0x11a   : > { %v658_v11 = vpop.f32.mrf.mxu0 }
 0x11b   : > { %v659_v12 = vadd.f32 %v2706_v45, %v658_v11  ;;  %2198 = vmatprep.mubr.msk.f32.mxu1 %vm714_vm1, %v695_v8  ;;  %v698_v14 = vmax.f32 %v664_v10, 0.0  ;;  %v1069_v45 = vld [vmem:[#allocation2] sm:$0x1] }
 0x11c   : > { %2199 = vmatmul.mubr.msk.f32.gmra.mxu1 %vm714_vm1, %v696_v9  ;;  %1072 = vperm.xlu0 %2360, %v1069_v45  }
 0x11d   : > { %v697_v13 = vmax.f32 %v659_v12, 0.0 }
 0x11f   : > { %2201 = vmatprep.mubr.msk.f32.mxu1 %vm714_vm1, %v697_v13 }
 0x120   : > { %2202 = vmatmul.mubr.msk.f32.gmra.mxu1 %vm714_vm1, %v698_v14 }
 0x1a4   : > { %v2779_v16 = vpop.f32.mrf.mxu1 }
 0x1a6   : > { %v2781_v17 = vpop.f32.mrf.mxu1 }
 0x1a8   : > { %v2783_v19 = vpop.f32.mrf.mxu1 }
 0x1aa   : > { %v2785_v20 = vpop.f32.mrf.mxu1 }
 0x1ac   : > { %v2787_v21 = vpop.f32.mrf.mxu1 }
 0x1ae   : > { %v2789_v22 = vpop.f32.mrf.mxu1 }
 0x1b0   : > { %v2791_v23 = vpop.f32.mrf.mxu1 }
 0x1b2   : > { %v2793_v24 = vpop.f32.mrf.mxu1 }
 0x1b4   : > { %v2170_v25 = vpop.f32.mrf.mxu1 }
 0x1b5   : > { %v923_v11 = vadd.f32 %v2170_v25, %v2812_v48  ;;  %v913_v25 = vadd.f32 %v2791_v23, %v2812_v48  ;;  %v903_v23 = vadd.f32 %v2787_v21, %v2812_v48  ;;  %v893_v21 = vadd.f32 %v2783_v19, %v2812_v48 }
 0x1b6   : > { %v2795_v26 = vpop.f32.mrf.mxu1  ;;  %v883_v19 = vadd.f32 %v2779_v16, %v2812_v48  ;;  %v1075_v16 = vlaneseq }
 0x1b7   : > { %v1045_v45 = vmax.f32 %v923_v11, 0.0  ;;  %v918_v18 = vadd.f32 %v2812_v48, %v2795_v26  ;;  %v908_v26 = vadd.f32 %v2812_v48, %v2793_v24  ;;  %v1041_v24 = vmax.f32 %v903_v23, 0.0 }
 0x1b8   : > { %v2173_v27 = vpop.f32.mrf.mxu1  ;;  %vm1281_vm2 = vcmp.lt.s32.totalorder %v1075_v16, 256 }
 0x1b9   : > { %v933_v3 = vadd.f32 %v2173_v27, %v2812_v48 }
 0x1ba   : > { %v927_v28 = vpop.f32.mrf.mxu1 }
 0x1bb   : > { %v1047_v7 = vmax.f32 %v933_v3, 0.0  ;;  %v928_v8 = vadd.f32 %v2812_v48, %v927_v28 }
 0x1bc   : > { %v2176_v29 = vpop.f32.mrf.mxu1 }
 0x1bd   : > { %v943_v59 = vadd.f32 %v2176_v29, %v2812_v48  ;;  %v1046_v12 = vmax.f32 %v928_v8, 0.0  ;;  %v1044_v29 = vmax.f32 %v918_v18, 0.0 }
 0x1be   : > { %v937_v30 = vpop.f32.mrf.mxu1 }
 0x1bf   : > { %v1049_v63 = vmax.f32 %v943_v59, 0.0  ;;  %v938_v0 = vadd.f32 %v2812_v48, %v937_v30 }
 0x1c0   : > { %v2179_v31 = vpop.f32.mrf.mxu1 }
 0x1c1   : > { %v953_v49 = vadd.f32 %v2179_v31, %v2812_v48  ;;  %v1048_v4 = vmax.f32 %v938_v0, 0.0 }
 0x1c2   : > { %v947_v32 = vpop.f32.mrf.mxu1 }
 0x1c3   : > { %v1051_v55 = vmax.f32 %v953_v49, 0.0  ;;  %v948_v56 = vadd.f32 %v2812_v48, %v947_v32  ;;  %v1043_v32 = vmax.f32 %v913_v25, 0.0 }
 0x1c4   : > { %v2797_v33 = vpop.f32.mrf.mxu1 }
 0x1c5   : > { %v1050_v60 = vmax.f32 %v948_v56, 0.0 }
 0x1c6   : > { %v2799_v34 = vpop.f32.mrf.mxu1 }
 0x1c8   : > { %v2801_v35 = vpop.f32.mrf.mxu1 }
 0x1ca   : > { %v2803_v36 = vpop.f32.mrf.mxu1 }
 0x1cb   : > { %v968_v49 = vadd.f32 %v2812_v48, %v2803_v36 }
 0x1cc   : > { %v2805_v37 = vpop.f32.mrf.mxu1 }
 0x1ce   : > { %v2807_v38 = vpop.f32.mrf.mxu1 }
 0x1d0   : > { %v2191_v39 = vpop.f32.mrf.mxu1 }
 0x1d1   : > { %v993_v27 = vadd.f32 %v2191_v39, %v2812_v48  ;;  %v983_v39 = vadd.f32 %v2805_v37, %v2812_v48  ;;  %v898_v37 = vadd.f32 %v2812_v48, %v2789_v22  ;;  %v1039_v22 = vmax.f32 %v893_v21, 0.0 }
 0x1d2   : > { %v987_v40 = vpop.f32.mrf.mxu1 }
 0x1d3   : > { %v1059_v30 = vmax.f32 %v993_v27, 0.0  ;;  %v988_v31 = vadd.f32 %v2812_v48, %v987_v40  ;;  %v1042_v40 = vmax.f32 %v908_v26, 0.0 }
 0x1d4   : > { %v2194_v41 = vpop.f32.mrf.mxu1 }
 0x1d5   : > { %v1003_v9 = vadd.f32 %v2194_v41, %v2812_v48  ;;  %v1058_v41 = vmax.f32 %v988_v31, 0.0 }
 0x1d6   : > { %v997_v42 = vpop.f32.mrf.mxu1 }
 0x1d7   : > { %v1061_v13 = vmax.f32 %v1003_v9, 0.0  ;;  %v998_v14 = vadd.f32 %v2812_v48, %v997_v42  ;;  %v1057_v42 = vmax.f32 %v983_v39, 0.0 }
 0x1d8   : > { %v2197_v43 = vpop.f32.mrf.mxu1 }
 0x1d9   : > { %v1013_v1 = vadd.f32 %v2197_v43, %v2812_v48  ;;  %v1060_v28 = vmax.f32 %v998_v14, 0.0  ;;  %v978_v43 = vadd.f32 %v2812_v48, %v2807_v38  ;;  %v1040_v38 = vmax.f32 %v898_v37, 0.0 }
 0x1da   : > { %v1007_v44 = vpop.f32.mrf.mxu1 }
 0x1db   : > { %v1063_v5 = vmax.f32 %v1013_v1, 0.0  ;;  %v1008_v6 = vadd.f32 %v2812_v48, %v1007_v44  ;;  %v973_v44 = vadd.f32 %v2801_v35, %v2812_v48  ;;  %v888_v35 = vadd.f32 %v2812_v48, %v2785_v20 }
 0x1dc   : > { %v2200_v46 = vpop.f32.mrf.mxu1  ;;  %v1037_v20 = vmax.f32 %v883_v19, 0.0 }
 0x1dd   : > { %v1023_v57 = vadd.f32 %v2200_v46, %v2812_v48  ;;  %v1062_v10 = vmax.f32 %v1008_v6, 0.0  ;;  %v1056_v46 = vmax.f32 %v978_v43, 0.0  ;;  %v1038_v36 = vmax.f32 %v888_v35, 0.0 }
 0x1de   : > { %v1017_v47 = vpop.f32.mrf.mxu1 }
 0x1df   : > { %v1065_v61 = vmax.f32 %v1023_v57, 0.0  ;;  %v1018_v62 = vadd.f32 %v2812_v48, %v1017_v47  ;;  %v1055_v47 = vmax.f32 %v973_v44, 0.0  ;;  %v1073_v57 = vpop.permute.xlu0 %1072 }
 0x1e0   : > { %v2203_v50 = vpop.f32.mrf.mxu1 }
 0x1e1   : > { %v1033_v51 = vadd.f32 %v2203_v50, %v2812_v48  ;;  %v1064_v2 = vmax.f32 %v1018_v62, 0.0  ;;  %v963_v50 = vadd.f32 %v2797_v33, %v2812_v48  ;;  %v878_v33 = vadd.f32 %v2812_v48, %v2781_v17 }
 0x1e2   : > { %v1027_v52 = vpop.f32.mrf.mxu1 }
 0x1e3   : > { %v1067_v53 = vmax.f32 %v1033_v51, 0.0  ;;  %v1028_v54 = vadd.f32 %v2812_v48, %v1027_v52  ;;  %v1054_v51 = vmax.f32 %v968_v49, 0.0  ;;  %v1053_v52 = vmax.f32 %v963_v50, 0.0 }
 0x1e5   : > { %v1066_v58 = vmax.f32 %v1028_v54, 0.0  ;;  %2050 = vmatprep.subr.msk.mxu0 %vm345_vm0, %v1067_v53  ;;  %v958_v53 = vadd.f32 %v2812_v48, %v2799_v34  ;;  %v1076_v34 = vshrl.u32 %v1075_v16, 7 }
 0x1e6   : > { %2051 = vmatpush3.xpose.msk.msra.mxu0 %vm345_vm0, %v1051_v55  ;;  %v1036_v55 = vmax.f32 %v878_v33, 0.0 }
 0x1e7   : > { %2052 = vmatprep.subr.msk.mxu0 %vm345_vm0, %v1066_v58  ;;  %v1052_v54 = vmax.f32 %v958_v53, 0.0  ;;  %v1077_v56 = vsub.s32 0, %v1076_v34 }
 0x1e9   : > { %v1078_v58 = vrot.slane %v1073_v57, %v1077_v56 }
 0x1ea   : > { %2053 = vmatpush3.xpose.msk.msra.mxu0 %vm345_vm0, %v1050_v60 }
 0x1eb   : > { %2054 = vmatprep.subr.msk.mxu0 %vm345_vm0, %v1065_v61 }
 0x1ee   : > { %2055 = vmatpush3.xpose.msk.msra.mxu0 %vm345_vm0, %v1049_v63 }
 0x1ef   : > { %2056 = vmatprep.subr.msk.mxu0 %vm345_vm0, %v1064_v2 }
 0x1f2   : > { %2057 = vmatpush3.xpose.msk.msra.mxu0 %vm345_vm0, %v1048_v4 }
 0x1f3   : > { %2058 = vmatprep.subr.msk.mxu0 %vm345_vm0, %v1063_v5 }
 0x1f6   : > { %2059 = vmatpush3.xpose.msk.msra.mxu0 %vm345_vm0, %v1047_v7 }
 0x1f7   : > { %2060 = vmatprep.subr.msk.mxu0 %vm345_vm0, %v1062_v10 }
 0x1fa   : > { %2061 = vmatpush3.xpose.msk.msra.mxu0 %vm345_vm0, %v1046_v12 }
 0x1fb   : > { %2062 = vmatprep.subr.msk.mxu0 %vm345_vm0, %v1061_v13 }
 0x1fe   : > { %2063 = vmatpush3.xpose.msk.msra.mxu0 %vm345_vm0, %v1045_v45 }
 0x1ff   : > { %2064 = vmatprep.subr.msk.mxu0 %vm345_vm0, %v1060_v28 }
 0x202   : > { %2065 = vmatpush3.xpose.msk.msra.mxu0 %vm345_vm0, %v1044_v29 }
 0x203   : > { %2066 = vmatprep.subr.msk.mxu0 %vm345_vm0, %v1059_v30 }
 0x206   : > { %2067 = vmatpush3.xpose.msk.msra.mxu0 %vm345_vm0, %v1043_v32 }
 0x207   : > { %2068 = vmatprep.subr.msk.mxu0 %vm345_vm0, %v1058_v41 }
 0x20a   : > { %2069 = vmatpush3.xpose.msk.msra.mxu0 %vm345_vm0, %v1042_v40 }
 0x20b   : > { %2070 = vmatprep.subr.msk.mxu0 %vm345_vm0, %v1057_v42 }
 0x20e   : > { %2071 = vmatpush3.xpose.msk.msra.mxu0 %vm345_vm0, %v1041_v24 }
 0x20f   : > { %2072 = vmatprep.subr.msk.mxu0 %vm345_vm0, %v1056_v46 }
 0x212   : > { %2073 = vmatpush3.xpose.msk.msra.mxu0 %vm345_vm0, %v1040_v38 }
 0x213   : > { %2074 = vmatprep.subr.msk.mxu0 %vm345_vm0, %v1055_v47 }
 0x216   : > { %2075 = vmatpush3.xpose.msk.msra.mxu0 %vm345_vm0, %v1039_v22 }
 0x217   : > { %2076 = vmatprep.subr.msk.mxu0 %vm345_vm0, %v1054_v51 }
 0x21a   : > { %2077 = vmatpush3.xpose.msk.msra.mxu0 %vm345_vm0, %v1038_v36 }
 0x21b   : > { %2078 = vmatprep.subr.msk.mxu0 %vm345_vm0, %v1053_v52 }
 0x21e   : > { %2079 = vmatpush3.xpose.msk.msra.mxu0 %vm345_vm0, %v1037_v20 }
 0x21f   : > { %2080 = vmatprep.subr.msk.mxu0 %vm345_vm0, %v1052_v54 }
 0x222   : > { %2081 = vmatpush3.xpose.msk.msra.mxu0 %vm345_vm0, %v1036_v55 }
 0x225   : > { %2083 = vmatmul.mubr.msk.f32.vlgmr.msra.gmra.mxu0 %vm345_vm0, %v2775_v15  ;;  %v2522_v15 = vmov 1966171168  }
 0x226   : > { %v1265_v3 = vunpack.c.l.s4 %v2522_v15 }
 0x228   : > { %v1266_v4 = vunpack.c.0.s8 %v1265_v3 }
 0x22a   : > { %v1269_v6 = vsub.s32 %v1266_v4, %v1076_v34 }
 0x2e5   : > { %v1244_v59 = vpop.f32.mrf.mxu0 }
 0x2e6   : > { %v1245_v60 = vadd.f32 %v1244_v59, %v1078_v58 }
 0x2e7   : > { %v1246_v17 = vpop.f32.mrf.mxu0 }
 0x2e8   : > { %v1939_v48 = vmul.f32 -1.442695, %v1245_v60  ;;  %v1247_v61 = vadd.f32 %v1246_v17, %v1078_v58 }
 0x2ea   : > { %2361 = vpow2.f32 %v1939_v48  ;;  %v1940_v62 = vmul.f32 -1.442695, %v1247_v61 }
 0x2ec   : > { %2363 = vpow2.f32 %v1940_v62 }
 0x2f7   : > { %v2362_v63 = vpop.eup %2361 }
 0x2f8   : > { %v1255_v0 = vadd.f32 1.0, %v2362_v63 }
 0x2f9   : > { %v2364_v1 = vpop.eup %2363 }
 0x2fa   : > { %v1256_v2 = vadd.f32 1.0, %v2364_v1  ;;  %2365 = vrcp.f32 %v1255_v0 }
 0x2fc   : > { %2367 = vrcp.f32 %v1256_v2 }
 0x307   : > { %v2366_v5 = vpop.eup %2365 }
 0x309   : > { %v2368_v7 = vpop.eup %2367 }
 0x30a   : > { %v1263_v8 = vcombine.low %v2366_v5, %v2368_v7 }
 0x30c   : > { %v1270_v9 = vrot.slane %v1263_v8, %v1269_v6  ;;  %1290 = sbr.rel (!%p2593_p4) target bundleno = 931 (0x3a3), region = 52 }
 0x30e   : > { %v1277_v10 = vrot.slane %v1270_v9, %v1269_v6 }
 0x310   : > { %1283 = vst.msk [vmem:[%s2896_s12] sm:$0x3] %vm1281_vm2, %v1277_v10 }
 0x311   : > { %s3346_s14 = smov (!%p1293_p8, %s1292_s14), 2 }
 0x312   : > { %s1943_s17 = sshll.u32 %s3346_s14, 4 }
 0x313   : > { %p1945_p9 = scmp.eq.s32.totalorder %s1943_s17, 0 }
 0x314   : > { %p1301_p10 = scmp.lt.u32.totalorder (!%p1945_p9), %s3346_s14, 8 }
 0x315   : > { %1300 = sbr.rel (%p1945_p9) target bundleno = 931 (0x3a3), region = 56 }
 0x31a   : > { %1304 = sbr.rel (%p1301_p10) target bundleno = 922 (0x39a), region = 60  ;;  %s2912_s10 = sand.u32 (!%p1301_p10), 7, %s3346_s14  }
 0x31b   : > { %p1321_p11 = scmp.eq.s32.totalorder (!%p1301_p10), %s2912_s10, 0  ;;  %p1946_p12 = scmp.ne.s32.totalorder (!%p1301_p10), %s2912_s10, 0 }
 0x31f   : > { %1324 = sbr.rel (%p1946_p12) target bundleno = 858 (0x35a), region = 75  ;;  %s1325_s6 = sshrl.u32 (!%p1946_p12), %s3346_s14, 3 }
 0x320   : > { %s2919_s18 = sshrl.u32 (!%p1946_p12), %s1325_s6, 6 }
 0x321   : > { %p1947_p13 = scmp.le.s32.totalorder (!%p1946_p12), %s2919_s18, 0 }
 0x324   : > { %1761 = sbr.rel (%p1947_p13) target bundleno = 842 (0x34a), region = 156  ;;  %s3330_s19 = smov (!%p1947_p13), %s2905_s16 }
 0x325   : > { %s3331_s20 = smov (!%p1947_p13), %s2896_s12  ;;  %s2928_s21 = smov (!%p1947_p13), 0  }
 0x326   : > { %s2930_s22 = smov (!%p1947_p13), 0  }
 0x329 LB: >> { %v1338_v11 = vld [vmem:[%s2463_s20] sm:$0xff]  ;;  %v1340_v12 = vld [vmem:[%s2463_s20 + $0x8] sm:$0xff]  ;;  %v1342_v13 = vld [vmem:[%s2463_s20 + $0x10] sm:$0xff]  ;;  %s1466_s23 = sadd.s32 1, %s2467_s21  ;;  %s1332_s22 = sadd.s32 1, %s2471_s22   ;;  %s2471_s22 = sphi %s2930_s22, %s1332_s22   ;;  %s2467_s21 = sphi %s2928_s21, %s3334_s21   ;;  %s2463_s20 = sphi %s3331_s20, %s3333_s20   ;;  %s2459_s19 = sphi %s3330_s19, %s3332_s19  }
 0x32a   : >> { %1339 = vst [vmem:[%s2459_s19] sm:$0xff] %v1338_v11  ;;  %1341 = vst [vmem:[%s2459_s19 + $0x8] sm:$0xff] %v1340_v12  ;;  %v1344_v14 = vld [vmem:[%s2463_s20 + $0x18] sm:$0xff]  ;;  %v1346_v45 = vld [vmem:[%s2463_s20 + $0x20] sm:$0xff]  ;;  %p1467_p0 = scmp.ge.s32.totalorder %s1466_s23, %s2919_s18  ;;  %p1331_p1 = scmp.ge.s32.totalorder %s1332_s22, %s2919_s18 }
 0x32b   : >> { %1343 = vst [vmem:[%s2459_s19 + $0x10] sm:$0xff] %v1342_v13  ;;  %v1348_v18 = vld [vmem:[%s2463_s20 + $0x28] sm:$0xff]  ;;  %1345 = vst [vmem:[%s2459_s19 + $0x18] sm:$0xff] %v1344_v14  ;;  %v1350_v27 = vld [vmem:[%s2463_s20 + $0x30] sm:$0xff] }
 0x32c   : >> { %1347 = vst [vmem:[%s2459_s19 + $0x20] sm:$0xff] %v1346_v45  ;;  %1349 = vst [vmem:[%s2459_s19 + $0x28] sm:$0xff] %v1348_v18  ;;  %v1352_v28 = vld [vmem:[%s2463_s20 + $0x38] sm:$0xff]  ;;  %v1354_v25 = vld [vmem:[%s2463_s20 + $0x40] sm:$0xff]  ;;  %s3348_s23 = smov (%p1467_p0, %s1466_s23), 0 }
 0x32d   : >> { %1351 = vst [vmem:[%s2459_s19 + $0x30] sm:$0xff] %v1350_v27  ;;  %1353 = vst [vmem:[%s2459_s19 + $0x38] sm:$0xff] %v1352_v28  ;;  %v1356_v29 = vld [vmem:[%s2463_s20 + $0x48] sm:$0xff]  ;;  %v1358_v30 = vld [vmem:[%s2463_s20 + $0x50] sm:$0xff]  ;;  %s1948_s24 = sshll.u32 %s3348_s23, 9  ;;  %s3334_s21 = smov %s3348_s23 }
 0x32e   : >> { %1355 = vst [vmem:[%s2459_s19 + $0x40] sm:$0xff] %v1354_v25  ;;  %v1360_v31 = vld [vmem:[%s2463_s20 + $0x58] sm:$0xff]  ;;  %1357 = vst [vmem:[%s2459_s19 + $0x48] sm:$0xff] %v1356_v29  ;;  %v1362_v32 = vld [vmem:[%s2463_s20 + $0x60] sm:$0xff]  ;;  %s2986_s25 = scalar_lea.vmem %s2896_s12, %s1948_s24 [#allocation3]   ;;  %s2989_s28 = scalar_lea.vmem %s2905_s16, %s1948_s24  }
 0x32f   : >> { %1359 = vst [vmem:[%s2459_s19 + $0x50] sm:$0xff] %v1358_v30  ;;  %1361 = vst [vmem:[%s2459_s19 + $0x58] sm:$0xff] %v1360_v31  ;;  %v1364_v26 = vld [vmem:[%s2463_s20 + $0x68] sm:$0xff]  ;;  %v1366_v39 = vld [vmem:[%s2463_s20 + $0x70] sm:$0xff] }
 0x330   : >> { %1363 = vst [vmem:[%s2459_s19 + $0x60] sm:$0xff] %v1362_v32  ;;  %1365 = vst [vmem:[%s2459_s19 + $0x68] sm:$0xff] %v1364_v26  ;;  %v1368_v41 = vld [vmem:[%s2463_s20 + $0x78] sm:$0xff]  ;;  %v1370_v23 = vld [vmem:[%s2463_s20 + $0x80] sm:$0xff] }
 0x331   : >> { %1367 = vst [vmem:[%s2459_s19 + $0x70] sm:$0xff] %v1366_v39  ;;  %v1372_v40 = vld [vmem:[%s2463_s20 + $0x88] sm:$0xff]  ;;  %1369 = vst [vmem:[%s2459_s19 + $0x78] sm:$0xff] %v1368_v41  ;;  %v1374_v42 = vld [vmem:[%s2463_s20 + $0x90] sm:$0xff] }
 0x332   : >> { %1371 = vst [vmem:[%s2459_s19 + $0x80] sm:$0xff] %v1370_v23  ;;  %1373 = vst [vmem:[%s2459_s19 + $0x88] sm:$0xff] %v1372_v40  ;;  %v1376_v43 = vld [vmem:[%s2463_s20 + $0x98] sm:$0xff]  ;;  %v1378_v24 = vld [vmem:[%s2463_s20 + $0xa0] sm:$0xff] }
 0x333   : >> { %1375 = vst [vmem:[%s2459_s19 + $0x90] sm:$0xff] %v1374_v42  ;;  %1377 = vst [vmem:[%s2459_s19 + $0x98] sm:$0xff] %v1376_v43  ;;  %v1380_v37 = vld [vmem:[%s2463_s20 + $0xa8] sm:$0xff]  ;;  %v1382_v44 = vld [vmem:[%s2463_s20 + $0xb0] sm:$0xff] }
 0x334   : >> { %1379 = vst [vmem:[%s2459_s19 + $0xa0] sm:$0xff] %v1378_v24  ;;  %v1384_v46 = vld [vmem:[%s2463_s20 + $0xb8] sm:$0xff]  ;;  %1381 = vst [vmem:[%s2459_s19 + $0xa8] sm:$0xff] %v1380_v37  ;;  %v1386_v21 = vld [vmem:[%s2463_s20 + $0xc0] sm:$0xff] }
 0x335   : >> { %1383 = vst [vmem:[%s2459_s19 + $0xb0] sm:$0xff] %v1382_v44  ;;  %1385 = vst [vmem:[%s2459_s19 + $0xb8] sm:$0xff] %v1384_v46  ;;  %v1388_v38 = vld [vmem:[%s2463_s20 + $0xc8] sm:$0xff]  ;;  %v1390_v47 = vld [vmem:[%s2463_s20 + $0xd0] sm:$0xff] }
 0x336   : >> { %1387 = vst [vmem:[%s2459_s19 + $0xc0] sm:$0xff] %v1386_v21  ;;  %1389 = vst [vmem:[%s2459_s19 + $0xc8] sm:$0xff] %v1388_v38  ;;  %v1392_v49 = vld [vmem:[%s2463_s20 + $0xd8] sm:$0xff]  ;;  %v1394_v22 = vld [vmem:[%s2463_s20 + $0xe0] sm:$0xff] }
 0x337   : >> { %1391 = vst [vmem:[%s2459_s19 + $0xd0] sm:$0xff] %v1390_v47  ;;  %v1396_v35 = vld [vmem:[%s2463_s20 + $0xe8] sm:$0xff]  ;;  %1393 = vst [vmem:[%s2459_s19 + $0xd8] sm:$0xff] %v1392_v49  ;;  %v1398_v50 = vld [vmem:[%s2463_s20 + $0xf0] sm:$0xff] }
 0x338   : >> { %1395 = vst [vmem:[%s2459_s19 + $0xe0] sm:$0xff] %v1394_v22  ;;  %1397 = vst [vmem:[%s2459_s19 + $0xe8] sm:$0xff] %v1396_v35  ;;  %v1400_v51 = vld [vmem:[%s2463_s20 + $0xf8] sm:$0xff]  ;;  %v1402_v19 = vld [vmem:[%s2463_s20 + $0x100] sm:$0xff] }
 0x339   : >> { %1399 = vst [vmem:[%s2459_s19 + $0xf0] sm:$0xff] %v1398_v50  ;;  %1401 = vst [vmem:[%s2459_s19 + $0xf8] sm:$0xff] %v1400_v51  ;;  %v1404_v36 = vld [vmem:[%s2463_s20 + $0x108] sm:$0xff]  ;;  %v1406_v52 = vld [vmem:[%s2463_s20 + $0x110] sm:$0xff] }
 0x33a   : >> { %1403 = vst [vmem:[%s2459_s19 + $0x100] sm:$0xff] %v1402_v19  ;;  %v1408_v53 = vld [vmem:[%s2463_s20 + $0x118] sm:$0xff]  ;;  %1405 = vst [vmem:[%s2459_s19 + $0x108] sm:$0xff] %v1404_v36  ;;  %v1410_v20 = vld [vmem:[%s2463_s20 + $0x120] sm:$0xff] }
 0x33b   : >> { %1407 = vst [vmem:[%s2459_s19 + $0x110] sm:$0xff] %v1406_v52  ;;  %1409 = vst [vmem:[%s2459_s19 + $0x118] sm:$0xff] %v1408_v53  ;;  %v1412_v33 = vld [vmem:[%s2463_s20 + $0x128] sm:$0xff]  ;;  %v1414_v54 = vld [vmem:[%s2463_s20 + $0x130] sm:$0xff] }
 0x33c   : >> { %1411 = vst [vmem:[%s2459_s19 + $0x120] sm:$0xff] %v1410_v20  ;;  %1413 = vst [vmem:[%s2459_s19 + $0x128] sm:$0xff] %v1412_v33  ;;  %v1416_v55 = vld [vmem:[%s2463_s20 + $0x138] sm:$0xff]  ;;  %v1418_v16 = vld [vmem:[%s2463_s20 + $0x140] sm:$0xff] }
 0x33d   : >> { %1415 = vst [vmem:[%s2459_s19 + $0x130] sm:$0xff] %v1414_v54  ;;  %v1420_v34 = vld [vmem:[%s2463_s20 + $0x148] sm:$0xff]  ;;  %1417 = vst [vmem:[%s2459_s19 + $0x138] sm:$0xff] %v1416_v55  ;;  %v1422_v56 = vld [vmem:[%s2463_s20 + $0x150] sm:$0xff] }
 0x33e   : >> { %1419 = vst [vmem:[%s2459_s19 + $0x140] sm:$0xff] %v1418_v16  ;;  %1421 = vst [vmem:[%s2459_s19 + $0x148] sm:$0xff] %v1420_v34  ;;  %v1424_v57 = vld [vmem:[%s2463_s20 + $0x158] sm:$0xff]  ;;  %v1426_v58 = vld [vmem:[%s2463_s20 + $0x160] sm:$0xff] }
 0x33f   : >> { %1423 = vst [vmem:[%s2459_s19 + $0x150] sm:$0xff] %v1422_v56  ;;  %1425 = vst [vmem:[%s2459_s19 + $0x158] sm:$0xff] %v1424_v57  ;;  %v1428_v59 = vld [vmem:[%s2463_s20 + $0x168] sm:$0xff]  ;;  %v1430_v60 = vld [vmem:[%s2463_s20 + $0x170] sm:$0xff] }
 0x340   : >> { %1427 = vst [vmem:[%s2459_s19 + $0x160] sm:$0xff] %v1426_v58  ;;  %v1432_v17 = vld [vmem:[%s2463_s20 + $0x178] sm:$0xff]  ;;  %1429 = vst [vmem:[%s2459_s19 + $0x168] sm:$0xff] %v1428_v59  ;;  %v1434_v48 = vld [vmem:[%s2463_s20 + $0x180] sm:$0xff] }
 0x341   : >> { %1431 = vst [vmem:[%s2459_s19 + $0x170] sm:$0xff] %v1430_v60  ;;  %1433 = vst [vmem:[%s2459_s19 + $0x178] sm:$0xff] %v1432_v17  ;;  %v1436_v61 = vld [vmem:[%s2463_s20 + $0x188] sm:$0xff]  ;;  %v1438_v62 = vld [vmem:[%s2463_s20 + $0x190] sm:$0xff] }
 0x342   : >> { %1435 = vst [vmem:[%s2459_s19 + $0x180] sm:$0xff] %v1434_v48  ;;  %1437 = vst [vmem:[%s2459_s19 + $0x188] sm:$0xff] %v1436_v61  ;;  %v1440_v63 = vld [vmem:[%s2463_s20 + $0x198] sm:$0xff]  ;;  %v1442_v0 = vld [vmem:[%s2463_s20 + $0x1a0] sm:$0xff] }
 0x343   : >> { %1439 = vst [vmem:[%s2459_s19 + $0x190] sm:$0xff] %v1438_v62  ;;  %v1444_v1 = vld [vmem:[%s2463_s20 + $0x1a8] sm:$0xff]  ;;  %1441 = vst [vmem:[%s2459_s19 + $0x198] sm:$0xff] %v1440_v63  ;;  %v1446_v2 = vld [vmem:[%s2463_s20 + $0x1b0] sm:$0xff] }
 0x344   : >> { %1443 = vst [vmem:[%s2459_s19 + $0x1a0] sm:$0xff] %v1442_v0  ;;  %1445 = vst [vmem:[%s2459_s19 + $0x1a8] sm:$0xff] %v1444_v1  ;;  %v1448_v15 = vld [vmem:[%s2463_s20 + $0x1b8] sm:$0xff]  ;;  %v1450_v3 = vld [vmem:[%s2463_s20 + $0x1c0] sm:$0xff] }
 0x345   : >> { %1447 = vst [vmem:[%s2459_s19 + $0x1b0] sm:$0xff] %v1446_v2  ;;  %1449 = vst [vmem:[%s2459_s19 + $0x1b8] sm:$0xff] %v1448_v15  ;;  %v1452_v4 = vld [vmem:[%s2463_s20 + $0x1c8] sm:$0xff]  ;;  %v1454_v5 = vld [vmem:[%s2463_s20 + $0x1d0] sm:$0xff]  ;;  %1334 = sbr.rel (!%p1331_p1) target bundleno = 809 (0x329), region = 162 }
 0x346   : >> { %1451 = vst [vmem:[%s2459_s19 + $0x1c0] sm:$0xff] %v1450_v3  ;;  %v1456_v6 = vld [vmem:[%s2463_s20 + $0x1d8] sm:$0xff]  ;;  %1453 = vst [vmem:[%s2459_s19 + $0x1c8] sm:$0xff] %v1452_v4  ;;  %v1458_v7 = vld [vmem:[%s2463_s20 + $0x1e0] sm:$0xff] }
 0x347   : >> { %1455 = vst [vmem:[%s2459_s19 + $0x1d0] sm:$0xff] %v1454_v5  ;;  %1457 = vst [vmem:[%s2459_s19 + $0x1d8] sm:$0xff] %v1456_v6  ;;  %v1460_v8 = vld [vmem:[%s2463_s20 + $0x1e8] sm:$0xff]  ;;  %v1462_v9 = vld [vmem:[%s2463_s20 + $0x1f0] sm:$0xff] }
 0x348   : >> { %1459 = vst [vmem:[%s2459_s19 + $0x1e0] sm:$0xff] %v1458_v7  ;;  %1461 = vst [vmem:[%s2459_s19 + $0x1e8] sm:$0xff] %v1460_v8  ;;  %v1464_v10 = vld [vmem:[%s2463_s20 + $0x1f8] sm:$0xff]  ;;  %s3333_s20 = smov %s2986_s25 }
 0x349   : >> { %1463 = vst [vmem:[%s2459_s19 + $0x1f0] sm:$0xff] %v1462_v9  ;;  %1465 = vst [vmem:[%s2459_s19 + $0x1f8] sm:$0xff] %v1464_v10  ;;  %s3332_s19 = smov %s2989_s28 }
 0x34a PF: > { %s3095_s30 = sand.u32 63, %s1325_s6   ;;  %s1970_s8 = sshll.u32 %s2919_s18, 13 }
 0x34b   : > { %s1477_s11 = sshra.s32 %s1970_s8, 4  ;;  %p1953_p2 = scmp.le.s32.totalorder %s3095_s30, 0 }
 0x34c   : > { %s1478_s13 = scalar_lea.vmem %s2896_s12, %s1477_s11 [#allocation3]   ;;  %s1481_s15 = scalar_lea.vmem %s2905_s16, %s1477_s11  }
 0x34d   : > { %1775 = sbr.rel (%p1953_p2) target bundleno = 858 (0x35a), region = 167  ;;  %s2473_s26 = smov (!%p1953_p2), %s1481_s15  }
 0x34e   : > { %s2477_s17 = smov (!%p1953_p2), %s1478_s13   ;;  %s2481_s23 = smov (!%p1953_p2), 0  }
 0x34f   : > { %s2485_s22 = smov (!%p1953_p2), 0  }
 0x352 LB: >> { %v1493_v11 = vld [vmem:[%s2479_s17] sm:$0xff]  ;;  %s1495_s6 = sadd.s32 1, %s2483_s23  ;;  %s1487_s22 = sadd.s32 1, %s2487_s22   ;;  %s2487_s22 = sphi %s2485_s22, %s1487_s22   ;;  %s2483_s23 = sphi %s2481_s23, %s2482_s23   ;;  %s2479_s17 = sphi %s2477_s17, %s1500_s17   ;;  %s2475_s26 = sphi %s2473_s26, %s1501_s26  }
 0x353   : >> { %1494 = vst [vmem:[%s2475_s26] sm:$0xff] %v1493_v11  ;;  %p1496_p3 = scmp.ge.s32.totalorder %s1495_s6, %s3095_s30  ;;  %p1486_p4 = scmp.ge.s32.totalorder %s1487_s22, %s3095_s30 }
 0x355   : >> { %s3350_s6 = smov (%p1496_p3, %s1495_s6), 0  ;;  %1489 = sbr.rel (!%p1486_p4) target bundleno = 850 (0x352), region = 173 }
 0x356   : >> { %s1954_s18 = sshll.u32 %s3350_s6, 3  ;;  %s2482_s23 = smov %s3350_s6  }
 0x357   : >> { %s1500_s17 = scalar_lea.vmem %s1478_s13, %s1954_s18 [#allocation3]   ;;  %s1501_s26 = scalar_lea.vmem %s1481_s15, %s1954_s18  }
 0x35a PF: > { %1504 = sbr.rel (%p1321_p11) target bundleno = 922 (0x39a), region = 93  ;;  %s3107_s19 = ssub.s32 (!%p1321_p11), %s3346_s14, %s2912_s10 }
 0x35b   : > { %s1510_s20 = sshrl.u32 (!%p1321_p11), %s3346_s14, 3  ;;  %s1507_s21 = scalar_lea.vmem (!%p1321_p11), %s2896_s12, %s3107_s19 [#allocation3] }
 0x35c   : > { %s1509_s24 = scalar_lea.vmem (!%p1321_p11), %s2905_s16, %s3107_s19  ;;  %s3116_s25 = sshrl.u32 (!%p1321_p11), %s1510_s20, 6 }
 0x35d   : > { %p1956_p5 = scmp.le.s32.totalorder (!%p1321_p11), %s3116_s25, 0 }
 0x35f   : > { %1789 = sbr.rel (%p1956_p5) target bundleno = 901 (0x385), region = 178  ;;  %s3335_s28 = smov (!%p1956_p5), %s2905_s16 }
 0x360   : > { %s3336_s30 = smov (!%p1956_p5), %s2896_s12  ;;  %s3125_s8 = smov (!%p1956_p5), 0  }
 0x361   : > { %s3127_s11 = smov (!%p1956_p5), 0  }
 0x364 LB: >> { %v1523_v12 = vld [vmem:[%s2495_s30] sm:$0xff]  ;;  %v1525_v13 = vld [vmem:[%s2495_s30 + $0x8] sm:$0xff]  ;;  %v1527_v14 = vld [vmem:[%s2495_s30 + $0x10] sm:$0xff]  ;;  %s1651_s13 = sadd.s32 1, %s2499_s8  ;;  %s1517_s11 = sadd.s32 1, %s2503_s11   ;;  %s2503_s11 = sphi %s3127_s11, %s1517_s11   ;;  %s2499_s8 = sphi %s3125_s8, %s3339_s8   ;;  %s2495_s30 = sphi %s3336_s30, %s3338_s30   ;;  %s2491_s28 = sphi %s3335_s28, %s3337_s28  }
 0x365   : >> { %1524 = vst [vmem:[%s2491_s28] sm:$0xff] %v1523_v12  ;;  %1526 = vst [vmem:[%s2491_s28 + $0x8] sm:$0xff] %v1525_v13  ;;  %v1529_v45 = vld [vmem:[%s2495_s30 + $0x18] sm:$0xff]  ;;  %v1531_v18 = vld [vmem:[%s2495_s30 + $0x20] sm:$0xff]  ;;  %p1652_p6 = scmp.ge.s32.totalorder %s1651_s13, %s3116_s25  ;;  %p1516_p7 = scmp.ge.s32.totalorder %s1517_s11, %s3116_s25 }
 0x366   : >> { %1528 = vst [vmem:[%s2491_s28 + $0x10] sm:$0xff] %v1527_v14  ;;  %v1533_v27 = vld [vmem:[%s2495_s30 + $0x28] sm:$0xff]  ;;  %1530 = vst [vmem:[%s2491_s28 + $0x18] sm:$0xff] %v1529_v45  ;;  %v1535_v28 = vld [vmem:[%s2495_s30 + $0x30] sm:$0xff] }
 0x367   : >> { %1532 = vst [vmem:[%s2491_s28 + $0x20] sm:$0xff] %v1531_v18  ;;  %1534 = vst [vmem:[%s2491_s28 + $0x28] sm:$0xff] %v1533_v27  ;;  %v1537_v25 = vld [vmem:[%s2495_s30 + $0x38] sm:$0xff]  ;;  %v1539_v29 = vld [vmem:[%s2495_s30 + $0x40] sm:$0xff]  ;;  %s3352_s13 = smov (%p1652_p6, %s1651_s13), 0 }
 0x368   : >> { %1536 = vst [vmem:[%s2491_s28 + $0x30] sm:$0xff] %v1535_v28  ;;  %1538 = vst [vmem:[%s2491_s28 + $0x38] sm:$0xff] %v1537_v25  ;;  %v1541_v30 = vld [vmem:[%s2495_s30 + $0x48] sm:$0xff]  ;;  %v1543_v31 = vld [vmem:[%s2495_s30 + $0x50] sm:$0xff]  ;;  %s1957_s15 = sshll.u32 %s3352_s13, 9  ;;  %s3339_s8 = smov %s3352_s13 }
 0x369   : >> { %1540 = vst [vmem:[%s2491_s28 + $0x40] sm:$0xff] %v1539_v29  ;;  %v1545_v32 = vld [vmem:[%s2495_s30 + $0x58] sm:$0xff]  ;;  %1542 = vst [vmem:[%s2491_s28 + $0x48] sm:$0xff] %v1541_v30  ;;  %v1547_v26 = vld [vmem:[%s2495_s30 + $0x60] sm:$0xff]  ;;  %s3183_s26 = scalar_lea.vmem %s2896_s12, %s1957_s15 [#allocation3]   ;;  %s3186_s17 = scalar_lea.vmem %s2905_s16, %s1957_s15  }
 0x36a   : >> { %1544 = vst [vmem:[%s2491_s28 + $0x50] sm:$0xff] %v1543_v31  ;;  %1546 = vst [vmem:[%s2491_s28 + $0x58] sm:$0xff] %v1545_v32  ;;  %v1549_v39 = vld [vmem:[%s2495_s30 + $0x68] sm:$0xff]  ;;  %v1551_v41 = vld [vmem:[%s2495_s30 + $0x70] sm:$0xff] }
 0x36b   : >> { %1548 = vst [vmem:[%s2491_s28 + $0x60] sm:$0xff] %v1547_v26  ;;  %1550 = vst [vmem:[%s2491_s28 + $0x68] sm:$0xff] %v1549_v39  ;;  %v1553_v23 = vld [vmem:[%s2495_s30 + $0x78] sm:$0xff]  ;;  %v1555_v40 = vld [vmem:[%s2495_s30 + $0x80] sm:$0xff] }
 0x36c   : >> { %1552 = vst [vmem:[%s2491_s28 + $0x70] sm:$0xff] %v1551_v41  ;;  %v1557_v42 = vld [vmem:[%s2495_s30 + $0x88] sm:$0xff]  ;;  %1554 = vst [vmem:[%s2491_s28 + $0x78] sm:$0xff] %v1553_v23  ;;  %v1559_v43 = vld [vmem:[%s2495_s30 + $0x90] sm:$0xff] }
 0x36d   : >> { %1556 = vst [vmem:[%s2491_s28 + $0x80] sm:$0xff] %v1555_v40  ;;  %1558 = vst [vmem:[%s2491_s28 + $0x88] sm:$0xff] %v1557_v42  ;;  %v1561_v24 = vld [vmem:[%s2495_s30 + $0x98] sm:$0xff]  ;;  %v1563_v37 = vld [vmem:[%s2495_s30 + $0xa0] sm:$0xff] }
 0x36e   : >> { %1560 = vst [vmem:[%s2491_s28 + $0x90] sm:$0xff] %v1559_v43  ;;  %1562 = vst [vmem:[%s2491_s28 + $0x98] sm:$0xff] %v1561_v24  ;;  %v1565_v44 = vld [vmem:[%s2495_s30 + $0xa8] sm:$0xff]  ;;  %v1567_v46 = vld [vmem:[%s2495_s30 + $0xb0] sm:$0xff] }
 0x36f   : >> { %1564 = vst [vmem:[%s2491_s28 + $0xa0] sm:$0xff] %v1563_v37  ;;  %v1569_v21 = vld [vmem:[%s2495_s30 + $0xb8] sm:$0xff]  ;;  %1566 = vst [vmem:[%s2491_s28 + $0xa8] sm:$0xff] %v1565_v44  ;;  %v1571_v38 = vld [vmem:[%s2495_s30 + $0xc0] sm:$0xff] }
 0x370   : >> { %1568 = vst [vmem:[%s2491_s28 + $0xb0] sm:$0xff] %v1567_v46  ;;  %1570 = vst [vmem:[%s2491_s28 + $0xb8] sm:$0xff] %v1569_v21  ;;  %v1573_v47 = vld [vmem:[%s2495_s30 + $0xc8] sm:$0xff]  ;;  %v1575_v49 = vld [vmem:[%s2495_s30 + $0xd0] sm:$0xff] }
 0x371   : >> { %1572 = vst [vmem:[%s2491_s28 + $0xc0] sm:$0xff] %v1571_v38  ;;  %1574 = vst [vmem:[%s2491_s28 + $0xc8] sm:$0xff] %v1573_v47  ;;  %v1577_v22 = vld [vmem:[%s2495_s30 + $0xd8] sm:$0xff]  ;;  %v1579_v35 = vld [vmem:[%s2495_s30 + $0xe0] sm:$0xff] }
 0x372   : >> { %1576 = vst [vmem:[%s2491_s28 + $0xd0] sm:$0xff] %v1575_v49  ;;  %v1581_v50 = vld [vmem:[%s2495_s30 + $0xe8] sm:$0xff]  ;;  %1578 = vst [vmem:[%s2491_s28 + $0xd8] sm:$0xff] %v1577_v22  ;;  %v1583_v51 = vld [vmem:[%s2495_s30 + $0xf0] sm:$0xff] }
 0x373   : >> { %1580 = vst [vmem:[%s2491_s28 + $0xe0] sm:$0xff] %v1579_v35  ;;  %1582 = vst [vmem:[%s2491_s28 + $0xe8] sm:$0xff] %v1581_v50  ;;  %v1585_v19 = vld [vmem:[%s2495_s30 + $0xf8] sm:$0xff]  ;;  %v1587_v36 = vld [vmem:[%s2495_s30 + $0x100] sm:$0xff] }
 0x374   : >> { %1584 = vst [vmem:[%s2491_s28 + $0xf0] sm:$0xff] %v1583_v51  ;;  %1586 = vst [vmem:[%s2491_s28 + $0xf8] sm:$0xff] %v1585_v19  ;;  %v1589_v52 = vld [vmem:[%s2495_s30 + $0x108] sm:$0xff]  ;;  %v1591_v53 = vld [vmem:[%s2495_s30 + $0x110] sm:$0xff] }
 0x375   : >> { %1588 = vst [vmem:[%s2491_s28 + $0x100] sm:$0xff] %v1587_v36  ;;  %v1593_v20 = vld [vmem:[%s2495_s30 + $0x118] sm:$0xff]  ;;  %1590 = vst [vmem:[%s2491_s28 + $0x108] sm:$0xff] %v1589_v52  ;;  %v1595_v33 = vld [vmem:[%s2495_s30 + $0x120] sm:$0xff] }
 0x376   : >> { %1592 = vst [vmem:[%s2491_s28 + $0x110] sm:$0xff] %v1591_v53  ;;  %1594 = vst [vmem:[%s2491_s28 + $0x118] sm:$0xff] %v1593_v20  ;;  %v1597_v54 = vld [vmem:[%s2495_s30 + $0x128] sm:$0xff]  ;;  %v1599_v55 = vld [vmem:[%s2495_s30 + $0x130] sm:$0xff] }
 0x377   : >> { %1596 = vst [vmem:[%s2491_s28 + $0x120] sm:$0xff] %v1595_v33  ;;  %1598 = vst [vmem:[%s2491_s28 + $0x128] sm:$0xff] %v1597_v54  ;;  %v1601_v16 = vld [vmem:[%s2495_s30 + $0x138] sm:$0xff]  ;;  %v1603_v34 = vld [vmem:[%s2495_s30 + $0x140] sm:$0xff] }
 0x378   : >> { %1600 = vst [vmem:[%s2491_s28 + $0x130] sm:$0xff] %v1599_v55  ;;  %v1605_v56 = vld [vmem:[%s2495_s30 + $0x148] sm:$0xff]  ;;  %1602 = vst [vmem:[%s2491_s28 + $0x138] sm:$0xff] %v1601_v16  ;;  %v1607_v57 = vld [vmem:[%s2495_s30 + $0x150] sm:$0xff] }
 0x379   : >> { %1604 = vst [vmem:[%s2491_s28 + $0x140] sm:$0xff] %v1603_v34  ;;  %1606 = vst [vmem:[%s2491_s28 + $0x148] sm:$0xff] %v1605_v56  ;;  %v1609_v58 = vld [vmem:[%s2495_s30 + $0x158] sm:$0xff]  ;;  %v1611_v59 = vld [vmem:[%s2495_s30 + $0x160] sm:$0xff] }
 0x37a   : >> { %1608 = vst [vmem:[%s2491_s28 + $0x150] sm:$0xff] %v1607_v57  ;;  %1610 = vst [vmem:[%s2491_s28 + $0x158] sm:$0xff] %v1609_v58  ;;  %v1613_v60 = vld [vmem:[%s2495_s30 + $0x168] sm:$0xff]  ;;  %v1615_v17 = vld [vmem:[%s2495_s30 + $0x170] sm:$0xff] }
 0x37b   : >> { %1612 = vst [vmem:[%s2491_s28 + $0x160] sm:$0xff] %v1611_v59  ;;  %v1617_v48 = vld [vmem:[%s2495_s30 + $0x178] sm:$0xff]  ;;  %1614 = vst [vmem:[%s2491_s28 + $0x168] sm:$0xff] %v1613_v60  ;;  %v1619_v61 = vld [vmem:[%s2495_s30 + $0x180] sm:$0xff] }
 0x37c   : >> { %1616 = vst [vmem:[%s2491_s28 + $0x170] sm:$0xff] %v1615_v17  ;;  %1618 = vst [vmem:[%s2491_s28 + $0x178] sm:$0xff] %v1617_v48  ;;  %v1621_v62 = vld [vmem:[%s2495_s30 + $0x188] sm:$0xff]  ;;  %v1623_v63 = vld [vmem:[%s2495_s30 + $0x190] sm:$0xff] }
 0x37d   : >> { %1620 = vst [vmem:[%s2491_s28 + $0x180] sm:$0xff] %v1619_v61  ;;  %1622 = vst [vmem:[%s2491_s28 + $0x188] sm:$0xff] %v1621_v62  ;;  %v1625_v0 = vld [vmem:[%s2495_s30 + $0x198] sm:$0xff]  ;;  %v1627_v1 = vld [vmem:[%s2495_s30 + $0x1a0] sm:$0xff] }
 0x37e   : >> { %1624 = vst [vmem:[%s2491_s28 + $0x190] sm:$0xff] %v1623_v63  ;;  %v1629_v2 = vld [vmem:[%s2495_s30 + $0x1a8] sm:$0xff]  ;;  %1626 = vst [vmem:[%s2491_s28 + $0x198] sm:$0xff] %v1625_v0  ;;  %v1631_v15 = vld [vmem:[%s2495_s30 + $0x1b0] sm:$0xff] }
 0x37f   : >> { %1628 = vst [vmem:[%s2491_s28 + $0x1a0] sm:$0xff] %v1627_v1  ;;  %1630 = vst [vmem:[%s2491_s28 + $0x1a8] sm:$0xff] %v1629_v2  ;;  %v1633_v3 = vld [vmem:[%s2495_s30 + $0x1b8] sm:$0xff]  ;;  %v1635_v4 = vld [vmem:[%s2495_s30 + $0x1c0] sm:$0xff] }
 0x380   : >> { %1632 = vst [vmem:[%s2491_s28 + $0x1b0] sm:$0xff] %v1631_v15  ;;  %1634 = vst [vmem:[%s2491_s28 + $0x1b8] sm:$0xff] %v1633_v3  ;;  %v1637_v5 = vld [vmem:[%s2495_s30 + $0x1c8] sm:$0xff]  ;;  %v1639_v6 = vld [vmem:[%s2495_s30 + $0x1d0] sm:$0xff]  ;;  %1519 = sbr.rel (!%p1516_p7) target bundleno = 868 (0x364), region = 184 }
 0x381   : >> { %1636 = vst [vmem:[%s2491_s28 + $0x1c0] sm:$0xff] %v1635_v4  ;;  %v1641_v7 = vld [vmem:[%s2495_s30 + $0x1d8] sm:$0xff]  ;;  %1638 = vst [vmem:[%s2491_s28 + $0x1c8] sm:$0xff] %v1637_v5  ;;  %v1643_v8 = vld [vmem:[%s2495_s30 + $0x1e0] sm:$0xff] }
 0x382   : >> { %1640 = vst [vmem:[%s2491_s28 + $0x1d0] sm:$0xff] %v1639_v6  ;;  %1642 = vst [vmem:[%s2491_s28 + $0x1d8] sm:$0xff] %v1641_v7  ;;  %v1645_v9 = vld [vmem:[%s2495_s30 + $0x1e8] sm:$0xff]  ;;  %v1647_v10 = vld [vmem:[%s2495_s30 + $0x1f0] sm:$0xff] }
 0x383   : >> { %1644 = vst [vmem:[%s2491_s28 + $0x1e0] sm:$0xff] %v1643_v8  ;;  %1646 = vst [vmem:[%s2491_s28 + $0x1e8] sm:$0xff] %v1645_v9  ;;  %v1649_v11 = vld [vmem:[%s2495_s30 + $0x1f8] sm:$0xff]  ;;  %s3338_s30 = smov %s3183_s26 }
 0x384   : >> { %1648 = vst [vmem:[%s2491_s28 + $0x1f0] sm:$0xff] %v1647_v10  ;;  %1650 = vst [vmem:[%s2491_s28 + $0x1f8] sm:$0xff] %v1649_v11  ;;  %s3337_s28 = smov %s3186_s17 }
 0x385 PF: > { %s3292_s23 = sand.u32 63, %s1510_s20   ;;  %s1972_s22 = sshll.u32 %s3116_s25, 13 }
 0x386   : > { %s1662_s6 = sshra.s32 %s1972_s22, 4  ;;  %p1962_p8 = scmp.le.s32.totalorder %s3292_s23, 0 }
 0x387   : > { %s1663_s18 = scalar_lea.vmem %s2896_s12, %s1662_s6 [#allocation3]   ;;  %s1666_s15 = scalar_lea.vmem %s2905_s16, %s1662_s6  }
 0x388   : > { %1803 = sbr.rel (%p1962_p8) target bundleno = 917 (0x395), region = 189  ;;  %s2505_s26 = smov (!%p1962_p8), %s1666_s15  }
 0x389   : > { %s2509_s13 = smov (!%p1962_p8), %s1663_s18   ;;  %s2513_s17 = smov (!%p1962_p8), 0  }
 0x38a   : > { %s2517_s11 = smov (!%p1962_p8), 0  }
 0x38d LB: >> { %v1678_v12 = vld [vmem:[%s2511_s13] sm:$0xff]  ;;  %s1680_s20 = sadd.s32 1, %s2515_s17  ;;  %s1672_s11 = sadd.s32 1, %s2519_s11   ;;  %s2519_s11 = sphi %s2517_s11, %s1672_s11   ;;  %s2515_s17 = sphi %s2513_s17, %s2514_s17   ;;  %s2511_s13 = sphi %s2509_s13, %s1685_s13   ;;  %s2507_s26 = sphi %s2505_s26, %s1686_s26  }
 0x38e   : >> { %1679 = vst [vmem:[%s2507_s26] sm:$0xff] %v1678_v12  ;;  %p1681_p9 = scmp.ge.s32.totalorder %s1680_s20, %s3292_s23  ;;  %p1671_p10 = scmp.ge.s32.totalorder %s1672_s11, %s3292_s23 }
 0x390   : >> { %s3354_s20 = smov (%p1681_p9, %s1680_s20), 0  ;;  %1674 = sbr.rel (!%p1671_p10) target bundleno = 909 (0x38d), region = 195 }
 0x391   : >> { %s1963_s25 = sshll.u32 %s3354_s20, 3  ;;  %s2514_s17 = smov %s3354_s20  }
 0x392   : >> { %s1685_s13 = scalar_lea.vmem %s1663_s18, %s1963_s25 [#allocation3]   ;;  %s1686_s26 = scalar_lea.vmem %s1666_s15, %s1963_s25  }
 0x395 PF: > { %s2523_s28 = smov 1  }
 0x396   : > { %s1687_s30 = sshll.u32 %s2523_s28, %s2912_s10 }
 0x397   : > { %s1965_s8 = sadd.s32 4294967295, %s1687_s30 }
 0x398   : > { %v1697_v13 = vld [vmem:[%s1507_s21] sm:%s1965_s8] }
 0x399   : > { %1698 = vst [vmem:[%s1509_s24] sm:%s1965_s8] %v1697_v13 }
 0x39a PF: > { %p1966_p11 = scmp.ge.u32.totalorder %s3346_s14, 8 }
 0x39b   : > { %s2524_s22 = smov (!%p1966_p11), 1  }
 0x39c   : > { %1307 = sbr.rel (%p1966_p11) target bundleno = 931 (0x3a3), region = 64  ;;  %s1308_s23 = sshll.u32 (!%p1966_p11), %s2524_s22, %s3346_s14 }
 0x39d   : > { %s1967_s6 = sadd.s32 (!%p1966_p11), 4294967295, %s1308_s23 }
 0x3a1   : > { %v1318_v14 = vld [vmem:[%s2896_s12] sm:%s1967_s6] }
 0x3a2   : > { %1319 = vst [vmem:[%s2905_s16] sm:%s1967_s6] %v1318_v14 }
 0x3a3 PF: > { %p16_p12 = scmp.ge.s32.totalorder %s2583_s29, 4   ;;  %s3340_s26 = smov %s2451_s27 }
 0x3a4   : > { %s3341_s27 = smov %s2591_s9  ;;  %s3342_s28 = smov %s2583_s29 }
 0x3a5   :  { %18 = sbr.rel (!%p16_p12) target bundleno = 5 (0x5), region = 206 }

</bundles_post_ra>
